<compile_context>
chip_gen: v6e
topology: v6e:2x2x1
jax: 0.10.0
libtpu: 0.0.40
codegen_flags: <defaults>
</compile_context>

<pallas_src>
import math

import jax
import jax.numpy as jnp
from jax import lax
from jax.experimental import pallas as pl
from jax.experimental.pallas import tpu as pltpu


def _round_up(x: int, m: int) -> int:
    return ((x + m - 1) // m) * m


# ----------------------------------------------------------------------------
# Buffer construction.
# ----------------------------------------------------------------------------
def build_pe(d_model: int, height: int, width: int) -> jnp.ndarray:
    """Full (d_model, H, W) buffer, mirroring the PyTorch __init__ (reference)."""
    if d_model % 4 != 0:
        raise ValueError("d_model must be divisible by 4")
    half = d_model // 2
    div_term = jnp.exp(
        jnp.arange(0.0, half, 2, dtype=jnp.float32) * -(math.log(10000.0) / half)
    )
    pos_w = jnp.arange(0.0, width, dtype=jnp.float32)[:, None]
    pos_h = jnp.arange(0.0, height, dtype=jnp.float32)[:, None]

    sin_w = jnp.sin(pos_w * div_term).T
    cos_w = jnp.cos(pos_w * div_term).T
    sin_h = jnp.sin(pos_h * div_term).T
    cos_h = jnp.cos(pos_h * div_term).T

    nq = half // 2
    pe = jnp.zeros((d_model, height, width), dtype=jnp.float32)
    pe = pe.at[0:half:2].set(jnp.broadcast_to(sin_w[:, None, :], (nq, height, width)))
    pe = pe.at[1:half:2].set(jnp.broadcast_to(cos_w[:, None, :], (nq, height, width)))
    pe = pe.at[half::2].set(jnp.broadcast_to(sin_h[:, :, None], (nq, height, width)))
    pe = pe.at[half + 1::2].set(jnp.broadcast_to(cos_h[:, :, None], (nq, height, width)))
    return pe


def build_pe_tables(d_model: int, height: int, width: int):
    """Separable per-axis tables.

    tab_w[w, :] == pe[0:half,      h, w]  (independent of h)
    tab_h[h, :] == pe[half:d_model, h, w] (independent of w)
    so pe[:, h, w] == concat(tab_w[w], tab_h[h]).
    """
    if d_model % 4 != 0:
        raise ValueError("d_model must be divisible by 4")
    half = d_model // 2
    div_term = jnp.exp(
        jnp.arange(0.0, half, 2, dtype=jnp.float32) * -(math.log(10000.0) / half)
    )  # (half//2,)
    pos_w = jnp.arange(0.0, width, dtype=jnp.float32)[:, None]   # (W, 1)
    pos_h = jnp.arange(0.0, height, dtype=jnp.float32)[:, None]  # (H, 1)

    sw, cw = jnp.sin(pos_w * div_term), jnp.cos(pos_w * div_term)  # (W, half//2)
    sh, ch = jnp.sin(pos_h * div_term), jnp.cos(pos_h * div_term)  # (H, half//2)
    # Interleave sin/cos along channel: [sin k0, cos k0, sin k1, cos k1, ...]
    tab_w = jnp.stack([sw, cw], axis=-1).reshape(width, half).astype(jnp.float32)
    tab_h = jnp.stack([sh, ch], axis=-1).reshape(height, half).astype(jnp.float32)
    return tab_h, tab_w


def positional_encoding_2d_init(d_model: int, height: int, width: int):
    """Precompute the combined, padded gather table (analogue of register_buffer).

    table layout, shape (K, d_pad) with d_pad = round_up(d_model, 128):
      row w              (w < W)  -> columns [0,    half)    hold tab_w[w], else 0
      row W_pad + h      (h < H)  -> columns [half, d_model) hold tab_h[h], else 0
    The two column ranges are disjoint, so summing one row from each sub-table
    (one matmul with a two-hot row) yields concat(tab_w[w], tab_h[h]) exactly.
    """
    tab_h, tab_w = build_pe_tables(d_model, height, width)
    half = d_model // 2
    d_pad = _round_up(d_model, 128)
    w_rows = _round_up(width, 8)
    h_rows = _round_up(height, 8)
    k_rows = _round_up(w_rows + h_rows, 128)  # lane-aligned contraction dim
    table = jnp.zeros((k_rows, d_pad), dtype=jnp.float32)
    table = table.at[:width, :half].set(tab_w)
    table = table.at[w_rows:w_rows + height, half:d_model].set(tab_h)
    return dict(table=table, h_off=w_rows, d_model=d_model, d_pad=d_pad,
                height=height, width=width)


# ----------------------------------------------------------------------------
# Pallas gather kernel (one-hot MXU gather, one unmasked store per tile).
# ----------------------------------------------------------------------------
def _pe_gather_kernel(w_ref, h_ref, tab_ref, out_ref):
    # w_ref / h_ref: VMEM (tile_n, 1) int32 combined-table row indices
    #   (w for the width half, W_pad + h for the height half).
    # tab_ref: VMEM (K, d_pad) f32 combined table (same block every grid step).
    # out_ref: VMEM (tile_n, d_pad) f32 — lane-dense, single unmasked store.
    tile_n = out_ref.shape[0]
    k_rows = tab_ref.shape[0]

    col = lax.broadcasted_iota(jnp.int32, (tile_n, k_rows), 1)
    # Two disjoint hits per row (width half / height half); the matmul sum is
    # the concatenation because the table column ranges do not overlap.
    hit = jnp.logical_or(col == w_ref[...], col == h_ref[...])
    onehot = jnp.where(hit, 1.0, 0.0).astype(jnp.float32)

    # HIGHEST precision: keep full f32 table accuracy on bf16-native MXUs
    # (v6e/v7x); the MXU is otherwise idle in this kernel so this is ~free.
    out_ref[...] = jnp.dot(
        onehot, tab_ref[...],
        preferred_element_type=jnp.float32,
        precision=lax.Precision.HIGHEST,
    )


def positional_encoding_2d_forward(state, pos: jnp.ndarray,
                                   tile_n: int = 1024) -> jnp.ndarray:
    """pos: (N, 2) int (h, w).  Returns (N, d_model) f32, matching
    PyTorch's pe[:, pos[:,0], pos[:,1]].transpose(0, -1)."""
    table = state["table"]
    height, width = state["height"], state["width"]
    d_model, d_pad = state["d_model"], state["d_pad"]
    h_off = state["h_off"]
    k_rows = table.shape[0]
    n = pos.shape[0]

    # Clamp indices -> no silent OOB VMEM reads inside the kernel.
    h_idx = jnp.clip(pos[:, 0].astype(jnp.int32), 0, height - 1) + h_off
    w_idx = jnp.clip(pos[:, 1].astype(jnp.int32), 0, width - 1)

    # Row tiling: big tiles to amortize ~0.35 us/step, capped so the output
    # double buffer stays <= ~8 MiB (well under v7x's 32 MiB scoped default),
    # and forced to >= 2 grid blocks when possible so both v7x TensorCores
    # get work ("parallel" axis).  Neutral on v5e/v6e (1 TC).
    n_ru = _round_up(max(n, 1), 8)
    tile_n = max(8, min(int(tile_n), n_ru))
    vmem_cap_rows = max(8, ((8 * 1024 * 1024) // (2 * d_pad * 4)) // 8 * 8)
    tile_n = min(tile_n, vmem_cap_rows)
    if n_ru > 8 and pl.cdiv(n_ru, tile_n) < 2:
        tile_n = _round_up(pl.cdiv(n_ru, 2), 8)
    tile_n = _round_up(tile_n, 8)
    n_blocks = pl.cdiv(n, tile_n)
    n_pad = n_blocks * tile_n

    # Zero-padded tail indices gather table row 0 (harmless; sliced off below).
    w2d = jnp.pad(w_idx, (0, n_pad - n)).reshape(n_pad, 1)
    h2d = jnp.pad(h_idx, (0, n_pad - n)).reshape(n_pad, 1)

    out = pl.pallas_call(
        _pe_gather_kernel,
        out_shape=jax.ShapeDtypeStruct((n_pad, d_pad), jnp.float32),
        grid_spec=pltpu.PrefetchScalarGridSpec(
            num_scalar_prefetch=0,
            grid=(n_blocks,),
            in_specs=[
                # Per-tile index slices (VMEM, tiny DMA per step).
                pl.BlockSpec((tile_n, 1), lambda i: (i, 0)),
                pl.BlockSpec((tile_n, 1), lambda i: (i, 0)),
                # Combined table: fully resident, same block every step (Pallas
                # skips re-fetch when the block index is unchanged).  For very
                # large H/W/d_model consider pipeline_mode=pl.Buffered(1) here.
                pl.BlockSpec((k_rows, d_pad), lambda i: (0, 0)),
            ],
            out_specs=pl.BlockSpec((tile_n, d_pad), lambda i: (i, 0)),
        ),
        compiler_params=pltpu.CompilerParams(
            dimension_semantics=("parallel",),
        ),
    )(w2d, h2d, table)

    # Strip row padding and lane padding (single contiguous prefix; no concat).
    return out[:n, :d_model]


# ----------------------------------------------------------------------------
# Demo / check.
# ----------------------------------------------------------------------------
if __name__ == "__main__":
    d_model, height, width = 32, 16, 16
    n_pos = 300  # exercises multi-block grid + row padding

    state = positional_encoding_2d_init(d_model, height, width)

    key = jax.random.PRNGKey(0)
    kh, kw = jax.random.split(key)
    pos_h = jax.random.randint(kh, (n_pos, 1), 0, height, dtype=jnp.int32)
    pos_w = jax.random.randint(kw, (n_pos, 1), 0, width, dtype=jnp.int32)
    pos = jnp.concatenate([pos_h, pos_w], axis=1)  # (N, 2) -> (h, w)

    out = positional_encoding_2d_forward(state, pos)
    out = jax.block_until_ready(out)

    # Pure-JAX reference of the PyTorch forward on the full buffer:
    #   pe[:, pos[:,0], pos[:,1]].T  -> (N, d_model)
    pe = build_pe(d_model, height, width)
    ref = jnp.transpose(pe[:, pos[:, 0], pos[:, 1]])

    assert out.shape == (n_pos, d_model)
    assert out.dtype == jnp.float32
    assert jnp.allclose(out, ref, atol=1e-6, rtol=0.0)

    print("KERNEL_OK")
</pallas_src>

<mosaic_0001>
module attributes {stable_mosaic.version = 11 : i64} {
  func.func @_pe_gather_kernel(%arg0: i32, %arg1: memref<152x1xi32, #tpu.memory_space<vmem>>, %arg2: memref<152x1xi32, #tpu.memory_space<vmem>>, %arg3: memref<128x128xf32, #tpu.memory_space<vmem>>, %arg4: memref<152x128xf32, #tpu.memory_space<vmem>>) attributes {dimension_semantics = [#tpu.dimension_semantics<parallel>], iteration_bounds = array<i64: 2>, scalar_prefetch = 0 : i64, scratch_operands = 0 : i64, tpu.core_type = #tpu.core_type<tc>, window_params = [{transform_indices = @transform_0, window_bounds = array<i64: 152, 1>}, {transform_indices = @transform_1, window_bounds = array<i64: 152, 1>}, {pipeline_mode = #tpu.pipeline_mode<synchronous>, transform_indices = @transform_2, window_bounds = array<i64: 128, 128>}, {transform_indices = @transform_3, window_bounds = array<i64: 152, 128>}]} {
    %0 = tpu.iota {dimensions = array<i32: 1>} : vector<152x128xi32>
    %c0 = arith.constant 0 : index
    %c0_0 = arith.constant 0 : index
    %1 = vector.load %arg1[%c0, %c0_0] : memref<152x1xi32, #tpu.memory_space<vmem>>, vector<152x1xi32>
    %2 = vector.broadcast %1 : vector<152x1xi32> to vector<152x128xi32>
    %3 = arith.cmpi eq, %0, %2 : vector<152x128xi32>
    %c0_1 = arith.constant 0 : index
    %c0_2 = arith.constant 0 : index
    %4 = vector.load %arg2[%c0_1, %c0_2] : memref<152x1xi32, #tpu.memory_space<vmem>>, vector<152x1xi32>
    %5 = vector.broadcast %4 : vector<152x1xi32> to vector<152x128xi32>
    %6 = arith.cmpi eq, %0, %5 : vector<152x128xi32>
    %7 = arith.ori %3, %6 : vector<152x128xi1>
    %cst = arith.constant 1.000000e+00 : f32
    %cst_3 = arith.constant 0.000000e+00 : f32
    %8 = vector.broadcast %cst : f32 to vector<152x128xf32>
    %9 = vector.broadcast %cst_3 : f32 to vector<152x128xf32>
    %10 = arith.select %7, %8, %9 : vector<152x128xi1>, vector<152x128xf32>
    %c0_4 = arith.constant 0 : index
    %c0_5 = arith.constant 0 : index
    %11 = vector.load %arg3[%c0_4, %c0_5] : memref<128x128xf32, #tpu.memory_space<vmem>>, vector<128x128xf32>
    %cst_6 = arith.constant dense<0.000000e+00> : vector<152x128xf32>
    %12 = tpu.matmul %10, %11, %cst_6 {dimension_numbers = #tpu.dot_dimension_numbers<[1], [0], [0], [1], [0, 0, 1, 1], [], []>, precision = #tpu.contract_precision<fp32>} : vector<152x128xf32>, vector<128x128xf32>, vector<152x128xf32> -> vector<152x128xf32>
    %c0_7 = arith.constant 0 : index
    %c0_8 = arith.constant 0 : index
    %13 = vector.load %arg4[%c0_7, %c0_8] : memref<152x128xf32, #tpu.memory_space<vmem>>, vector<152x128xf32>
    tpu.vector_store %arg4[%c0_7, %c0_8], %12 {strides = array<i32>} : memref<152x128xf32, #tpu.memory_space<vmem>>, vector<152x128xf32>,
    return
  }
  func.func @transform_0(%arg0: i32) -> (i32, i32) {
    %c0_i32 = arith.constant 0 : i32
    %c0_i32_0 = arith.constant 0 : i32
    return %arg0, %c0_i32 : i32, i32
  }
  func.func @transform_1(%arg0: i32) -> (i32, i32) {
    %c0_i32 = arith.constant 0 : i32
    %c0_i32_0 = arith.constant 0 : i32
    return %arg0, %c0_i32 : i32, i32
  }
  func.func @transform_2(%arg0: i32) -> (i32, i32) {
    %c0_i32 = arith.constant 0 : i32
    %c0_i32_0 = arith.constant 0 : i32
    %c0_i32_1 = arith.constant 0 : i32
    return %c0_i32, %c0_i32_0 : i32, i32
  }
  func.func @transform_3(%arg0: i32) -> (i32, i32) {
    %c0_i32 = arith.constant 0 : i32
    %c0_i32_0 = arith.constant 0 : i32
    return %arg0, %c0_i32 : i32, i32
  }
}

</mosaic_0001>

<bundles_post_ra>
// kernel: tpu_custom_call.1
= control target key start
LH: loop header
LB: loop body
LE: loop exit
PB: predicated region body
PF: predicated region fallthrough
CT: control target
= control target key end

     0   :  { %8 = vsyncpa [#allocation3], 0  ;;  %s4209_s0 = inlined_call_operand.vmem [shape: s32[304,1], index: 0, kind: input, shape index: {}]   ;;  %s4210_s1 = inlined_call_operand.vmem [shape: s32[304,1], index: 1, kind: input, shape index: {}]   ;;  %s4211_s2 = inlined_call_operand.vmem [shape: f32[128,128], index: 2, kind: input, shape index: {}]   ;;  %s4212_s3 = inlined_call_operand.hbm [shape: f32[304,128], index: 3, kind: output, shape index: {}]  }
   0x1   :  { %10 = vsyncpa [#allocation3 + $0x1], 0  ;;  %s2796_s12 = smov 0   ;;  %s2798_s13 = smov 0  }
   0x2   :  { %s2800_s14 = smov 0   ;;  %s2802_s15 = smov 0  }
   0x3 LB: > { %s2817_s16 = sadd.s32 4294967295, %s2767_s15   ;;  %s1848_s17 = sadd.s32 4294967294, %s2767_s15   ;;  %s2767_s15 = sphi %s2802_s15, %s4400_s15   ;;  %s2763_s14 = sphi %s2800_s14, %s4399_s14   ;;  %s2759_s13 = sphi %s2798_s13, %s4398_s13   ;;  %s2755_s12 = sphi %s2796_s12, %s4397_s12  }
   0x4   : > { %s2821_s18 = sadd.s32 1, %s2767_s15   ;;  %s96_s19 = sadd.s32 1, %s2763_s14 }
   0x5   : > { %s93_s20 = ssub.s32 %s2767_s15, %s2821_s18  ;;  %p106_p0 = scmp.ne.s32.totalorder %s2763_s14, %s2759_s13 }
   0x6   : > { %p94_p1 = scmp.eq.s32.totalorder %s93_s20, 0  ;;  %p107_p2 = scmp.eq.s32.totalorder %s2817_s16, 1 }
   0x7   : > { %p112_p3 = scmp.ne.s32.totalorder %s2759_s13, %s2755_s12  ;;  %p113_p4 = scmp.eq.s32.totalorder %s1848_s17, 1 }
   0x8   : > { %s2832_s21 = scalar_select %p94_p1, %s2763_s14, %s96_s19  }
   0x9   : > { %p2834_p5 = por %p107_p2, %p106_p0  ;;  %p2838_p6 = por %p113_p4, %p112_p3 }
   0xa   : > { %p1851_p7 = scmp.ge.s32.totalorder %s2767_s15, 1  ;;  %p152_p8 = scmp.lt.s32.totalorder %s2767_s15, 3 }
   0xc   : > { %p153_p9 = pnand %p1851_p7, %p152_p8 }
   0xe   : > { %156 = sbr.rel (%p153_p9) target bundleno = 603 (0x25b), region = 32 }
  0x13   : > { %s181_s24 = smul.u32 19, %s2817_s16  ;;  %v439_v0 = vld [vmem:[%s4211_s2 + $0x78] sm:$0xff]  ;;  %v438_v1 = vld [vmem:[%s4211_s2 + $0x70] sm:$0xff]  ;;  %v437_v2 = vld [vmem:[%s4211_s2 + $0x68] sm:$0xff]  ;;  %v2769_v3 = vmov 0   ;;  %v2770_v10 = vmov 0.0  }
  0x14   : > { %2706 = vset.pattern.permute.xlu1 %v2769_v3  ;;  %2705 = vset.pattern.permute.xlu0 %v2769_v3  ;;  %v2854_v4 = vand.u32 4294901760, %v439_v0  ;;  %v2856_v5 = vand.u32 4294901760, %v438_v1  ;;  %v2858_v6 = vand.u32 4294901760, %v437_v2  ;;  %v436_v7 = vld [vmem:[%s4211_s2 + $0x60] sm:$0xff]  ;;  %v435_v8 = vld [vmem:[%s4211_s2 + $0x58] sm:$0xff]  ;;  %v434_v9 = vld [vmem:[%s4211_s2 + $0x50] sm:$0xff] }
  0x15   : > { %p182_p10 = scmp.lt.s32.totalorder %s181_s24, 37  ;;  %2214 = vmatprep.subr.mxu1 %v2770_v10  ;;  %v2870_v11 = vand.u32 4294901760, %v436_v7  ;;  %2125 = vmatprep.subr.mxu0 %v2770_v10  ;;  %v2873_v12 = vand.u32 4294901760, %v435_v8  ;;  %v2889_v17 = vand.u32 4294901760, %v434_v9  ;;  %v433_v18 = vld [vmem:[%s4211_s2 + $0x48] sm:$0xff]  ;;  %v432_v27 = vld [vmem:[%s4211_s2 + $0x40] sm:$0xff] }
  0x16   : > { %v2876_v13 = vsub.f32 %v439_v0, %v2854_v4  ;;  %v2879_v14 = vsub.f32 %v438_v1, %v2856_v5  ;;  %v2882_v15 = vsub.f32 %v437_v2, %v2858_v6  ;;  %2126 = vmatpush3.msra.mxu0 %v2854_v4  ;;  %v2920_v26 = vand.u32 4294901760, %v433_v18  ;;  %v431_v33 = vld [vmem:[%s4211_s2 + $0x38] sm:$0xff]  ;;  %v430_v44 = vld [vmem:[%s4211_s2 + $0x30] sm:$0xff]  ;;  %v429_v52 = vld [vmem:[%s4211_s2 + $0x28] sm:$0xff]  ;;  %s1914_s4 = smul.u32 2432, %s2817_s16  ;;  %s2773_s10 = smov [#allocation2]  }
  0x17   : > { %s4402_s24 = smov (!%p182_p10, %s181_s24), 37  ;;  %v2886_v16 = vsub.f32 %v436_v7, %v2870_v11  ;;  %2127 = vmatprep.subr.mxu0 %v2770_v10  ;;  %v2899_v22 = vsub.f32 %v435_v8, %v2873_v12  ;;  %v2931_v31 = vsub.f32 %v434_v9, %v2889_v17  ;;  %v2941_v38 = vand.u32 4294901760, %v432_v27  ;;  %v428_v55 = vld [vmem:[%s4211_s2 + $0x20] sm:$0xff]  ;;  %v427_v2 = vld [vmem:[%s4211_s2 + $0x18] sm:$0xff]  ;;  %s2711_s11 = sshll.u32 %s2773_s10, 4  ;;  %s2712_s11 = int_to_ptr.vmem [resolvable:$false] %s2711_s11 }
  0x18   : > { %v4231_v19 = vand.u32 4294901760, %v2876_v13  ;;  %v4228_v20 = vand.u32 4294901760, %v2879_v14  ;;  %v4227_v21 = vand.u32 4294901760, %v2882_v15  ;;  %2128 = vmatpush3.msra.mxu0 %v2856_v5  ;;  %s1852_s17 = sshll.u32 %s4402_s24, 3  ;;  %v2947_v40 = vsub.f32 %v433_v18, %v2920_v26  ;;  %s4162_s8 = scalar_lea.hbm %s4212_s3, %s1914_s4 }
  0x19   : > { %2129 = vmatprep.subr.mxu0 %v2770_v10  ;;  %s2905_s25 = scalar_lea.vmem %s4209_s0, %s1852_s17  ;;  %s2910_s28 = scalar_lea.vmem %s4210_s1, %s1852_s17  ;;  %v4225_v25 = vand.u32 4294901760, %v2886_v16  ;;  %v4224_v37 = vand.u32 4294901760, %v2899_v22  ;;  %v4223_v42 = vand.u32 4294901760, %v2931_v31  ;;  %v2953_v43 = vand.u32 4294901760, %v431_v33 }
  0x1a   : > { %v696_v23 = vsub.f32 %v2876_v13, %v4231_v19  ;;  %v703_v24 = vsub.f32 %v2879_v14, %v4228_v20  ;;  %2130 = vmatpush3.msra.mxu0 %v2858_v6  ;;  %v197_v28 = vld [vmem:[%s2905_s25 + $0x8] sm:$0xff]  ;;  %v196_v29 = vld [vmem:[%s2905_s25] sm:$0xff]  ;;  %v710_v30 = vsub.f32 %v2882_v15, %v4227_v21  ;;  %v293_v45 = vld [vmem:[%s2910_s28 + $0x10] sm:$0xff]  ;;  %v2964_v48 = vsub.f32 %v432_v27, %v2941_v38  ;;  %s2713_s17 = scalar_lea.vmem %s2712_s11, 4864 }
  0x1b   : > { %2131 = vmatprep.subr.mxu0 %v2770_v10  ;;  %219 = vperm.xlu1 %2706, %v197_v28   ;;  %v292_v34 = vld [vmem:[%s2910_s28 + $0x8] sm:$0xff]  ;;  %v291_v35 = vld [vmem:[%s2910_s28] sm:$0xff]  ;;  %v717_v39 = vsub.f32 %v2886_v16, %v4225_v25  ;;  %v198_v46 = vld [vmem:[%s2905_s25 + $0x10] sm:$0xff]  ;;  %v724_v47 = vsub.f32 %v2899_v22, %v4224_v37  ;;  %v4222_v50 = vand.u32 4294901760, %v2947_v40  ;;  %v2970_v51 = vand.u32 4294901760, %v430_v44 }
  0x1c   : > { %216 = vperm.xlu0 %2705, %v196_v29   ;;  %v697_v32 = vand.u32 4294901760, %v696_v23  ;;  %v704_v36 = vand.u32 4294901760, %v703_v24  ;;  %2132 = vmatpush3.msra.mxu0 %v2870_v11  ;;  %v711_v41 = vand.u32 4294901760, %v710_v30  ;;  %v731_v53 = vsub.f32 %v2931_v31, %v4223_v42  ;;  %v294_v56 = vld [vmem:[%s2910_s28 + $0x18] sm:$0xff]  ;;  %v295_v3 = vld [vmem:[%s2910_s28 + $0x20] sm:$0xff]  ;;  %v426_v27 = vld [vmem:[%s4211_s2 + $0x10] sm:$0xff] }
  0x1d   : > { %2133 = vmatprep.subr.mxu0 %v2770_v10  ;;  %v718_v49 = vand.u32 4294901760, %v717_v39  ;;  %v2979_v54 = vsub.f32 %v431_v33, %v2953_v43  ;;  %v199_v57 = vld [vmem:[%s2905_s25 + $0x18] sm:$0xff]  ;;  %v725_v58 = vand.u32 4294901760, %v724_v47  ;;  %v4221_v59 = vand.u32 4294901760, %v2964_v48  ;;  %v200_v7 = vld [vmem:[%s2905_s25 + $0x20] sm:$0xff]  ;;  %v425_v30 = vld [vmem:[%s4211_s2 + $0x8] sm:$0xff] }
  0x1e   : > { %2215 = vmatpush3.msra.mxu1 %v697_v32  ;;  %2134 = vmatpush3.msra.mxu0 %v2873_v12  ;;  %v2990_v60 = vand.u32 4294901760, %v429_v52  ;;  %v738_v61 = vsub.f32 %v2947_v40, %v4222_v50  ;;  %v2996_v62 = vsub.f32 %v430_v44, %v2970_v51  ;;  %v732_v63 = vand.u32 4294901760, %v731_v53  ;;  %v296_v32 = vld [vmem:[%s2910_s28 + $0x28] sm:$0xff]  ;;  %v424_v47 = vld [vmem:[%s4211_s2] sm:$0xff] }
  0x1f   : > { %2216 = vmatprep.subr.mxu1 %v2770_v10  ;;  %314 = vperm.xlu1 %2706, %v292_v34   ;;  %v4220_v0 = vand.u32 4294901760, %v2979_v54  ;;  %v3002_v1 = vand.u32 4294901760, %v428_v55  ;;  %v745_v8 = vsub.f32 %v2964_v48, %v4221_v59  ;;  %v3019_v24 = vand.u32 4294901760, %v427_v2  ;;  %v201_v33 = vld [vmem:[%s2905_s25 + $0x28] sm:$0xff] }
  0x20   : > { %311 = vperm.xlu0 %2705, %v291_v35   ;;  %2217 = vmatpush3.msra.mxu1 %v704_v36  ;;  %v3013_v9 = vsub.f32 %v429_v52, %v2990_v60  ;;  %v739_v18 = vand.u32 4294901760, %v738_v61  ;;  %v4219_v23 = vand.u32 4294901760, %v2996_v62  ;;  %v3039_v36 = vand.u32 4294901760, %v426_v27  ;;  %v202_v52 = vld [vmem:[%s2905_s25 + $0x30] sm:$0xff] }
  0x21   : > { %2135 = vmatprep.subr.mxu0 %v2770_v10  ;;  %2218 = vmatprep.subr.mxu1 %v2770_v10  ;;  %v752_v28 = vsub.f32 %v2979_v54, %v4220_v0  ;;  %v3028_v29 = vsub.f32 %v428_v55, %v3002_v1  ;;  %v746_v34 = vand.u32 4294901760, %v745_v8  ;;  %vm2771_vm0 = vmmov 0  }
  0x22   : > { %2136 = vmatpush3.msra.mxu0 %v2889_v17  ;;  %2219 = vmatpush3.msra.mxu1 %v711_v41  ;;  %v4218_v35 = vand.u32 4294901760, %v3013_v9  ;;  %v759_v39 = vsub.f32 %v2996_v62, %v4219_v23  ;;  %v3045_v41 = vsub.f32 %v427_v2, %v3019_v24  ;;  %v3062_v55 = vsub.f32 %v426_v27, %v3039_v36  ;;  %v298_v2 = vld [vmem:[%s2910_s28 + $0x38] sm:$0xff] }
  0x23   : > { %2137 = vmatprep.subr.mxu0 %v2770_v10  ;;  %317 = vperm.xlu1 %2706, %v293_v45   ;;  %v753_v44 = vand.u32 4294901760, %v752_v28  ;;  %v4217_v45 = vand.u32 4294901760, %v3028_v29 }
  0x24   : > { %222 = vperm.xlu0 %2705, %v198_v46   ;;  %2220 = vmatprep.subr.mxu1 %v2770_v10  ;;  %v3051_v46 = vand.u32 4294901760, %v425_v30  ;;  %v766_v53 = vsub.f32 %v3013_v9, %v4218_v35  ;;  %v4215_v8 = vand.u32 4294901760, %v3062_v55 }
  0x25   : > { %2138 = vmatpush3.msra.mxu0 %v2920_v26  ;;  %2221 = vmatpush3.msra.mxu1 %v718_v49  ;;  %v297_v49 = vld [vmem:[%s2910_s28 + $0x30] sm:$0xff]  ;;  %v773_v61 = vsub.f32 %v3028_v29, %v4217_v45 }
  0x26   : > { %2139 = vmatprep.subr.mxu0 %v2770_v10  ;;  %2222 = vmatprep.subr.mxu1 %v2770_v10 }
  0x27   : > { %2140 = vmatpush3.msra.mxu0 %v2941_v38  ;;  %320 = vperm.xlu1 %2706, %v294_v56   ;;  %v760_v56 = vand.u32 4294901760, %v759_v39  ;;  %v774_v28 = vand.u32 4294901760, %v773_v61 }
  0x28   : > { %225 = vperm.xlu0 %2705, %v199_v57   ;;  %2223 = vmatpush3.msra.mxu1 %v725_v58  ;;  %v4216_v57 = vand.u32 4294901760, %v3045_v41  ;;  %v3068_v58 = vand.u32 4294901760, %v424_v47 }
  0x29   : > { %2141 = vmatprep.subr.mxu0 %v2770_v10  ;;  %2224 = vmatprep.subr.mxu1 %v2770_v10 }
  0x2a   : > { %2142 = vmatpush3.msra.mxu0 %v2953_v43  ;;  %2225 = vmatpush3.msra.mxu1 %v732_v63  ;;  %v3074_v63 = vsub.f32 %v425_v30, %v3051_v46  ;;  %v3087_v27 = vsub.f32 %v424_v47, %v3068_v58 }
  0x2b   : > { %2143 = vmatprep.subr.mxu0 %v2770_v10  ;;  %323 = vperm.xlu1 %2706, %v295_v3   ;;  %v203_v3 = vld [vmem:[%s2905_s25 + $0x38] sm:$0xff] }
  0x2c   : > { %228 = vperm.xlu0 %2705, %v200_v7   ;;  %2226 = vmatprep.subr.mxu1 %v2770_v10  ;;  %v767_v7 = vand.u32 4294901760, %v766_v53  ;;  %v4214_v30 = vand.u32 4294901760, %v3074_v63 }
  0x2d   : > { %2144 = vmatpush3.msra.mxu0 %v2970_v51  ;;  %2227 = vmatpush3.msra.mxu1 %v739_v18  ;;  %v780_v18 = vsub.f32 %v3045_v41, %v4216_v57 }
  0x2e   : > { %2145 = vmatprep.subr.mxu0 %v2770_v10  ;;  %2228 = vmatprep.subr.mxu1 %v2770_v10  ;;  %v794_v47 = vsub.f32 %v3074_v63, %v4214_v30 }
  0x2f   : > { %2146 = vmatpush3.msra.mxu0 %v2990_v60  ;;  %326 = vperm.xlu1 %2706, %v296_v32   ;;  %v299_v32 = vld [vmem:[%s2910_s28 + $0x40] sm:$0xff]  ;;  %v781_v39 = vand.u32 4294901760, %v780_v18  ;;  %v302_v18 = vld [vmem:[%s2910_s28 + $0x58] sm:$0xff] }
  0x30   : > { %231 = vperm.xlu0 %2705, %v201_v33   ;;  %2229 = vmatpush3.msra.mxu1 %v746_v34  ;;  %v204_v33 = vld [vmem:[%s2905_s25 + $0x40] sm:$0xff]  ;;  %v787_v34 = vsub.f32 %v3062_v55, %v4215_v8  ;;  %v795_v61 = vand.u32 4294901760, %v794_v47  ;;  %v305_v47 = vld [vmem:[%s2910_s28 + $0x70] sm:$0xff] }
  0x31   : > { %2147 = vmatprep.subr.mxu0 %v2770_v10  ;;  %2230 = vmatprep.subr.mxu1 %v2770_v10 }
  0x32   : > { %2148 = vmatpush3.msra.mxu0 %v3002_v1  ;;  %2231 = vmatpush3.msra.mxu1 %v753_v44  ;;  %v4213_v44 = vand.u32 4294901760, %v3087_v27  ;;  %v788_v53 = vand.u32 4294901760, %v787_v34  ;;  %v304_v34 = vld [vmem:[%s2910_s28 + $0x68] sm:$0xff] }
  0x33   : > { %2246 = vmatprep.mubr.msk.f32.mxu1 %vm2771_vm0, %v2770_v10  ;;  %329 = vperm.xlu1 %2706, %v297_v49   ;;  %v300_v49 = vld [vmem:[%s2910_s28 + $0x48] sm:$0xff] }
  0x34   : > { %234 = vperm.xlu0 %2705, %v202_v52   ;;  %2232 = vmatprep.subr.mxu1 %v2770_v10  ;;  %v205_v52 = vld [vmem:[%s2905_s25 + $0x48] sm:$0xff] }
  0x35   : > { %2149 = vmatprep.subr.mxu0 %v2770_v10  ;;  %2233 = vmatpush3.msra.mxu1 %v760_v56  ;;  %v801_v56 = vsub.f32 %v3087_v27, %v4213_v44 }
  0x36   : > { %2150 = vmatpush3.msra.mxu0 %v3019_v24  ;;  %2234 = vmatprep.subr.mxu1 %v2770_v10 }
  0x37   : > { %2151 = vmatprep.subr.mxu0 %v2770_v10  ;;  %332 = vperm.xlu1 %2706, %v298_v2   ;;  %v301_v2 = vld [vmem:[%s2910_s28 + $0x50] sm:$0xff] }
  0x38   : > { %237 = vperm.xlu0 %2705, %v203_v3   ;;  %2235 = vmatpush3.msra.mxu1 %v767_v7  ;;  %v206_v3 = vld [vmem:[%s2905_s25 + $0x50] sm:$0xff]  ;;  %v802_v7 = vand.u32 4294901760, %v801_v56  ;;  %v307_v56 = vld [vmem:[%s2910_s28 + $0x80] sm:$0xff] }
  0x39   : > { %2152 = vmatpush3.msra.mxu0 %v3039_v36  ;;  %2236 = vmatprep.subr.mxu1 %v2770_v10 }
  0x3a   : > { %2153 = vmatprep.subr.mxu0 %v2770_v10  ;;  %2237 = vmatpush3.msra.mxu1 %v774_v28  ;;  %v207_v28 = vld [vmem:[%s2905_s25 + $0x58] sm:$0xff] }
  0x3b   : > { %2154 = vmatpush3.msra.mxu0 %v3051_v46  ;;  %335 = vperm.xlu1 %2706, %v299_v32   ;;  %v303_v32 = vld [vmem:[%s2910_s28 + $0x60] sm:$0xff] }
  0x3c   : > { %240 = vperm.xlu0 %2705, %v204_v33   ;;  %2238 = vmatprep.subr.mxu1 %v2770_v10  ;;  %v208_v33 = vld [vmem:[%s2905_s25 + $0x60] sm:$0xff] }
  0x3d   : > { %2155 = vmatprep.subr.mxu0 %v2770_v10  ;;  %2239 = vmatpush3.msra.mxu1 %v781_v39  ;;  %v209_v39 = vld [vmem:[%s2905_s25 + $0x68] sm:$0xff] }
  0x3e   : > { %2156 = vmatpush3.msra.mxu0 %v3068_v58  ;;  %2240 = vmatprep.subr.mxu1 %v2770_v10 }
  0x3f   : > { %2157 = vmatprep.mubr.msk.f32.mxu0 %vm2771_vm0, %v2770_v10  ;;  %338 = vperm.xlu1 %2706, %v300_v49   ;;  %v210_v49 = vld [vmem:[%s2905_s25 + $0x70] sm:$0xff] }
  0x40   : > { %243 = vperm.xlu0 %2705, %v205_v52   ;;  %2241 = vmatpush3.msra.mxu1 %v788_v53  ;;  %v306_v52 = vld [vmem:[%s2910_s28 + $0x78] sm:$0xff] }
  0x41   : > { %2303 = vmatprep.subr.mxu0 %v2770_v10  ;;  %2242 = vmatprep.subr.mxu1 %v2770_v10  ;;  %v211_v53 = vld [vmem:[%s2905_s25 + $0x78] sm:$0xff] }
  0x42   : > { %2243 = vmatpush3.msra.mxu1 %v795_v61  ;;  %v212_v61 = vld [vmem:[%s2905_s25 + $0x80] sm:$0xff] }
  0x43   : > { %341 = vperm.xlu1 %2706, %v301_v2   ;;  %2244 = vmatprep.subr.mxu1 %v2770_v10  ;;  %v308_v2 = vld [vmem:[%s2910_s28 + $0x88] sm:$0xff] }
  0x44   : > { %246 = vperm.xlu0 %2705, %v206_v3   ;;  %2245 = vmatpush3.msra.mxu1 %v802_v7  ;;  %v213_v3 = vld [vmem:[%s2905_s25 + $0x88] sm:$0xff]  ;;  %v309_v7 = vld [vmem:[%s2910_s28 + $0x90] sm:$0xff] }
  0x45   : > { %2392 = vmatprep.subr.mxu1 %v2770_v10 }
  0x47   : > { %344 = vperm.xlu1 %2706, %v302_v18   ;;  %v214_v18 = vld [vmem:[%s2905_s25 + $0x90] sm:$0xff]  ;;  %s178_s25 = sand.u32 1, %s2759_s13  }
  0x48   : > { %249 = vperm.xlu0 %2705, %v207_v28   ;;  %v194_v28 = vlaneseq  ;;  %s2659_s28 = smul.u32 152, %s178_s25  ;;  %s4169_s16 = scalar_lea.sflag [#allocation3], %s178_s25 }
  0x4a   : > { %s4119_s30 = scalar_lea.vmem [#allocation2], %s2659_s28 }
  0x4b   : > { %347 = vperm.xlu1 %2706, %v303_v32   ;;  %s1774_s5 = sshll.u32 %s4119_s30, 4  ;;  %s4164_s5 = int_to_ptr.vmem [resolvable:$true] %s1774_s5 }
  0x4c   : > { %252 = vperm.xlu0 %2705, %v208_v33   ;;  %s2707_s9 = scalar_lea.vmem %s4164_s5, 2432  ;;  %p2714_p0 = scmp.lt.s32.totalorder %s4164_s5, %s2712_s11 }
  0x4d   : > { %p2708_p11 = scmp.ne.s32.totalorder %s4164_s5, %s2707_s9  ;;  %p2715_p1 = scmp.lt.s32.totalorder %s2713_s17, %s2707_s9 }
  0x4f   : > { %350 = vperm.xlu1 %2706, %v304_v34   ;;  %v3139_v34 = vand.u32 127, %v194_v28  ;;  %v4295_v28 = vmov 0  ;;  %p2709_p12 = pnand %p2708_p11, %p2834_p5  ;;  %p2716_p2 = por %p2715_p1, %p2714_p0 }
  0x50   : > { %255 = vperm.xlu0 %2705, %v209_v39  }
  0x51   : > { %p2710_p13 = pneg %p2709_p12 }
  0x53   : > { %353 = vperm.xlu1 %2706, %v305_v47   ;;  %p2717_p3 = pnand %p2716_p2, %p2710_p13 }
  0x54   : > { %258 = vperm.xlu0 %2705, %v210_v49   ;;  %v4290_v49 = vmov 0 }
  0x57   : > { %356 = vperm.xlu1 %2706, %v306_v52  }
  0x58   : > { %261 = vperm.xlu0 %2705, %v211_v53  }
  0x5b   : > { %359 = vperm.xlu1 %2706, %v307_v56  }
  0x5c   : > { %264 = vperm.xlu0 %2705, %v212_v61  }
  0x5f   : > { %362 = vperm.xlu1 %2706, %v308_v2   ;;  %v2772_v2 = vmov 1.0  }
  0x60   : > { %267 = vperm.xlu0 %2705, %v213_v3  }
  0x63   : > { %365 = vperm.xlu1 %2706, %v309_v7  }
  0x64   : > { %270 = vperm.xlu0 %2705, %v214_v18  }
  0x96   : > { %v220_v32 = vpop.permute.xlu1 %219 }
  0x97   : > { %v217_v33 = vpop.permute.xlu0 %216  ;;  %vm273_vm1 = vcmp.eq.s32.totalorder %v3139_v34, %v220_v32 }
  0x98   : > { %vm272_vm4 = vcmp.eq.s32.totalorder %v3139_v34, %v217_v33 }
  0x9a   : > { %v315_v39 = vpop.permute.xlu1 %314 }
  0x9b   : > { %v312_v47 = vpop.permute.xlu0 %311  ;;  %vm368_vm2 = vcmp.eq.s32.totalorder %v3139_v34, %v315_v39 }
  0x9c   : > { %vm367_vm3 = vcmp.eq.s32.totalorder %v3139_v34, %v312_v47  ;;  %vm3145_vm5 = vmor %vm273_vm1, %vm368_vm2 }
  0x9d   : > { %v4291_v49 = vsel %vm3145_vm5, 4294967295, %v4290_v49  ;;  %v406_v52 = vsel %vm3145_vm5, 1.0, %v2770_v10  ;;  %vm3152_vm6 = vmor %vm272_vm4, %vm367_vm3 }
  0x9e   : > { %4292 = vst [vmem:[#allocation5_spill] sm:$0xff] %v4291_v49  ;;  %v3156_v56 = vsub.f32 %v406_v52, %v406_v52  ;;  %v405_v61 = vsel %vm3152_vm6, 1.0, %v2770_v10  ;;  %2247 = vmatmul.mubr.msk.f32.vlgmr.msra.gmra.mxu1 %vm3152_vm6, %v2772_v2  ;;  %v318_v3 = vpop.permute.xlu1 %317 }
  0x9f   : > { %v223_v7 = vpop.permute.xlu0 %222  ;;  %v3164_v18 = vsub.f32 %v405_v61, %v405_v61  ;;  %vm369_vm7 = vcmp.eq.s32.totalorder %v3139_v34, %v318_v3  ;;  %2249 = vmatprep.mubr.msk.f32.mxu1 %vm2771_vm0, %v2770_v10  ;;  %2393 = vmatpush3.msra.mxu1 %v2854_v4 }
  0xa0   : > { %vm274_vm8 = vcmp.eq.s32.totalorder %v3139_v34, %v223_v7  ;;  %2394 = vmatprep.subr.mxu1 %v2770_v10  ;;  %v4234_v39 = vand.u32 4294901760, %v3156_v56  ;;  %v4298_v7 = vmov 0 }
  0xa1   : > { %vm3171_vm9 = vmor %vm274_vm8, %vm369_vm7  ;;  %v4236_v33 = vand.u32 4294901760, %v3164_v18  ;;  %2395 = vmatpush3.msra.mxu1 %v2856_v5 }
  0xa2   : > { %v4296_v28 = vsel %vm3171_vm9, 4294967295, %v4295_v28  ;;  %v407_v32 = vsel %vm3171_vm9, 1.0, %v2770_v10  ;;  %2250 = vmatmul.mubr.msk.f32.gmra.mxu1 %vm3145_vm5, %v2772_v2  ;;  %v321_v52 = vpop.permute.xlu1 %320  ;;  %2396 = vmatprep.subr.mxu1 %v2770_v10 }
  0xa3   : > { %4297 = vst [vmem:[#allocation6_spill] sm:$0xff] %v4296_v28  ;;  %v3182_v47 = vsub.f32 %v407_v32, %v407_v32  ;;  %v226_v61 = vpop.permute.xlu0 %225  ;;  %vm370_vm10 = vcmp.eq.s32.totalorder %v3139_v34, %v321_v52  ;;  %2252 = vmatprep.mubr.msk.f32.mxu1 %vm2771_vm0, %v2770_v10  ;;  %v523_v3 = vsub.f32 %v3164_v18, %v4236_v33 }
  0xa4   : > { %vm275_vm11 = vcmp.eq.s32.totalorder %v3139_v34, %v226_v61  ;;  %2397 = vmatpush3.msra.mxu1 %v2858_v6  ;;  %v532_v61 = vsub.f32 %v3156_v56, %v4234_v39 }
  0xa5   : > { %vm3196_vm12 = vmor %vm275_vm11, %vm370_vm10  ;;  %2398 = vmatprep.subr.mxu1 %v2770_v10  ;;  %v524_v52 = vand.u32 4294901760, %v523_v3  ;;  %v4233_v44 = vand.u32 4294901760, %v3182_v47  ;;  %v4301_v3 = vmov 0 }
  0xa6   : > { %v4299_v7 = vsel %vm3196_vm12, 4294967295, %v4298_v7  ;;  %v408_v32 = vsel %vm3196_vm12, 1.0, %v2770_v10  ;;  %2399 = vmatpush3.msra.mxu1 %v2870_v11  ;;  %v324_v8 = vpop.permute.xlu1 %323 }
  0xa7   : > { %4300 = vst [vmem:[#allocation7_spill] sm:$0xff] %v4299_v7  ;;  %v3209_v30 = vsub.f32 %v408_v32, %v408_v32  ;;  %2253 = vmatmul.mubr.msk.f32.gmra.mxu1 %vm3171_vm9, %v2772_v2  ;;  %v229_v57 = vpop.permute.xlu0 %228  ;;  %2400 = vmatprep.subr.mxu1 %v2770_v10  ;;  %vm371_vm13 = vcmp.eq.s32.totalorder %v3139_v34, %v324_v8  ;;  %v533_v8 = vand.u32 4294901760, %v532_v61  ;;  %v4304_v61 = vmov 0 }
  0xa8   : > { %2158 = vmatmul.mubr.f32.vlgmr.msra.gmra.mxu0 %v524_v52  ;;  %vm276_vm14 = vcmp.eq.s32.totalorder %v3139_v34, %v229_v57  ;;  %2255 = vmatprep.mubr.msk.f32.mxu1 %vm2771_vm0, %v2770_v10  ;;  %v541_v57 = vsub.f32 %v3182_v47, %v4233_v44 }
  0xa9   : > { %2304 = vmatpush3.msra.mxu0 %v2876_v13  ;;  %vm3220_vm15 = vmor %vm276_vm14, %vm371_vm13  ;;  %2160 = vmatprep.mubr.msk.f32.mxu0 %vm2771_vm0, %v2770_v10  ;;  %v4230_v52 = vand.u32 4294901760, %v3209_v30 }
  0xaa   : > { %v4302_v3 = vsel %vm3220_vm15, 4294967295, %v4301_v3  ;;  %v409_v32 = vsel %vm3220_vm15, 1.0, %v2770_v10  ;;  %2305 = vmatprep.subr.mxu0 %v2770_v10  ;;  %2401 = vmatpush3.msra.mxu1 %v2873_v12  ;;  %v327_v35 = vpop.permute.xlu1 %326 }
  0xab   : > { %4303 = vst [vmem:[#allocation8_spill] sm:$0xff] %v4302_v3  ;;  %v3235_v45 = vsub.f32 %v409_v32, %v409_v32  ;;  %2256 = vmatmul.mubr.msk.f32.gmra.mxu1 %vm3196_vm12, %v2772_v2  ;;  %v232_v23 = vpop.permute.xlu0 %231  ;;  %2306 = vmatpush3.msra.mxu0 %v2879_v14  ;;  %vm372_vm1 = vcmp.eq.s32.totalorder %v3139_v34, %v327_v35  ;;  %v542_v35 = vand.u32 4294901760, %v541_v57  ;;  %v4307_v57 = vmov 0 }
  0xac   : > { %2161 = vmatmul.mubr.f32.gmra.mxu0 %v533_v8  ;;  %vm277_vm2 = vcmp.eq.s32.totalorder %v3139_v34, %v232_v23  ;;  %2258 = vmatprep.mubr.msk.f32.mxu1 %vm2771_vm0, %v2770_v10  ;;  %v550_v23 = vsub.f32 %v3209_v30, %v4230_v52 }
  0xad   : > { %vm3245_vm3 = vmor %vm277_vm2, %vm372_vm1  ;;  %2163 = vmatprep.mubr.msk.f32.mxu0 %vm2771_vm0, %v2770_v10  ;;  %2307 = vmatprep.subr.mxu0 %v2770_v10  ;;  %v4226_v8 = vand.u32 4294901760, %v3235_v45 }
  0xae   : > { %v4305_v61 = vsel %vm3245_vm3, 4294967295, %v4304_v61  ;;  %v410_v32 = vsel %vm3245_vm3, 1.0, %v2770_v10  ;;  %2308 = vmatpush3.msra.mxu0 %v2882_v15  ;;  %2402 = vmatprep.subr.mxu1 %v2770_v10  ;;  %v330_v59 = vpop.permute.xlu1 %329 }
  0xaf   : > { %4306 = vst [vmem:[#allocation9_spill] sm:$0xff] %v4305_v61  ;;  %v3261_v0 = vsub.f32 %v410_v32, %v410_v32  ;;  %2259 = vmatmul.mubr.msk.f32.gmra.mxu1 %vm3220_vm15, %v2772_v2  ;;  %v235_v50 = vpop.permute.xlu0 %234  ;;  %2309 = vmatprep.subr.mxu0 %v2770_v10  ;;  %vm373_vm4 = vcmp.eq.s32.totalorder %v3139_v34, %v330_v59  ;;  %v551_v59 = vand.u32 4294901760, %v550_v23  ;;  %v4310_v23 = vmov 0 }
  0xb0   : > { %2164 = vmatmul.mubr.f32.gmra.mxu0 %v542_v35  ;;  %vm278_vm7 = vcmp.eq.s32.totalorder %v3139_v34, %v235_v50  ;;  %2261 = vmatprep.mubr.msk.f32.mxu1 %vm2771_vm0, %v2770_v10  ;;  %v559_v50 = vsub.f32 %v3235_v45, %v4226_v8 }
  0xb1   : > { %vm3271_vm8 = vmor %vm278_vm7, %vm373_vm4  ;;  %2166 = vmatprep.mubr.msk.f32.mxu0 %vm2771_vm0, %v2770_v10  ;;  %2310 = vmatpush3.msra.mxu0 %v2886_v16  ;;  %v4229_v35 = vand.u32 4294901760, %v3261_v0 }
  0xb2   : > { %v4308_v57 = vsel %vm3271_vm8, 4294967295, %v4307_v57  ;;  %v411_v32 = vsel %vm3271_vm8, 1.0, %v2770_v10  ;;  %2311 = vmatprep.subr.mxu0 %v2770_v10  ;;  %2403 = vmatpush3.msra.mxu1 %v2889_v17  ;;  %v333_v37 = vpop.permute.xlu1 %332 }
  0xb3   : > { %4309 = vst [vmem:[#allocation10_spill] sm:$0xff] %v4308_v57  ;;  %v3287_v42 = vsub.f32 %v411_v32, %v411_v32  ;;  %2262 = vmatmul.mubr.msk.f32.gmra.mxu1 %vm3245_vm3, %v2772_v2  ;;  %v238_v25 = vpop.permute.xlu0 %237  ;;  %2312 = vmatpush3.msra.mxu0 %v2899_v22  ;;  %vm374_vm10 = vcmp.eq.s32.totalorder %v3139_v34, %v333_v37  ;;  %v560_v37 = vand.u32 4294901760, %v559_v50  ;;  %v4313_v50 = vmov 0 }
  0xb4   : > { %2167 = vmatmul.mubr.f32.gmra.mxu0 %v551_v59  ;;  %vm279_vm11 = vcmp.eq.s32.totalorder %v3139_v34, %v238_v25  ;;  %2264 = vmatprep.mubr.msk.f32.mxu1 %vm2771_vm0, %v2770_v10  ;;  %v568_v25 = vsub.f32 %v3261_v0, %v4229_v35 }
  0xb5   : > { %vm3297_vm13 = vmor %vm279_vm11, %vm374_vm10  ;;  %2169 = vmatprep.mubr.msk.f32.mxu0 %vm2771_vm0, %v2770_v10  ;;  %2313 = vmatprep.subr.mxu0 %v2770_v10  ;;  %v4232_v59 = vand.u32 4294901760, %v3287_v42 }
  0xb6   : > { %v4311_v23 = vsel %vm3297_vm13, 4294967295, %v4310_v23  ;;  %v412_v32 = vsel %vm3297_vm13, 1.0, %v2770_v10  ;;  %2314 = vmatpush3.msra.mxu0 %v2931_v31  ;;  %2404 = vmatprep.subr.mxu1 %v2770_v10  ;;  %v336_v21 = vpop.permute.xlu1 %335 }
  0xb7   : > { %4312 = vst [vmem:[#allocation11_spill] sm:$0xff] %v4311_v23  ;;  %v3313_v8 = vsub.f32 %v412_v32, %v412_v32  ;;  %2265 = vmatmul.mubr.msk.f32.gmra.mxu1 %vm3271_vm8, %v2772_v2  ;;  %v241_v20 = vpop.permute.xlu0 %240  ;;  %2315 = vmatprep.subr.mxu0 %v2770_v10  ;;  %vm375_vm14 = vcmp.eq.s32.totalorder %v3139_v34, %v336_v21  ;;  %v569_v21 = vand.u32 4294901760, %v568_v25  ;;  %v4316_v25 = vmov 0 }
  0xb8   : > { %2170 = vmatmul.mubr.f32.gmra.mxu0 %v560_v37  ;;  %vm280_vm1 = vcmp.eq.s32.totalorder %v3139_v34, %v241_v20  ;;  %2267 = vmatprep.mubr.msk.f32.mxu1 %vm2771_vm0, %v2770_v10  ;;  %v577_v20 = vsub.f32 %v3287_v42, %v4232_v59 }
  0xb9   : > { %vm3323_vm2 = vmor %vm280_vm1, %vm375_vm14  ;;  %2172 = vmatprep.mubr.msk.f32.mxu0 %vm2771_vm0, %v2770_v10  ;;  %2316 = vmatpush3.msra.mxu0 %v2947_v40  ;;  %v4235_v37 = vand.u32 4294901760, %v3313_v8 }
  0xba   : > { %v4314_v50 = vsel %vm3323_vm2, 4294967295, %v4313_v50  ;;  %v413_v32 = vsel %vm3323_vm2, 1.0, %v2770_v10  ;;  %2405 = vmatpush3.msra.mxu1 %v2920_v26  ;;  %2317 = vmatprep.subr.mxu0 %v2770_v10  ;;  %v339_v52 = vpop.permute.xlu1 %338 }
  0xbb   : > { %4315 = vst [vmem:[#allocation12_spill] sm:$0xff] %v4314_v50  ;;  %v3339_v35 = vsub.f32 %v413_v32, %v413_v32  ;;  %2268 = vmatmul.mubr.msk.f32.gmra.mxu1 %vm3297_vm13, %v2772_v2  ;;  %v244_v19 = vpop.permute.xlu0 %243  ;;  %2318 = vmatpush3.msra.mxu0 %v2964_v48  ;;  %vm376_vm4 = vcmp.eq.s32.totalorder %v3139_v34, %v339_v52  ;;  %v578_v52 = vand.u32 4294901760, %v577_v20  ;;  %v4319_v20 = vmov 0 }
  0xbc   : > { %2173 = vmatmul.mubr.f32.gmra.mxu0 %v569_v21  ;;  %vm281_vm7 = vcmp.eq.s32.totalorder %v3139_v34, %v244_v19  ;;  %2270 = vmatprep.mubr.msk.f32.mxu1 %vm2771_vm0, %v2770_v10  ;;  %v586_v19 = vsub.f32 %v3313_v8, %v4235_v37 }
  0xbd   : > { %vm3349_vm10 = vmor %vm281_vm7, %vm376_vm4  ;;  %2175 = vmatprep.mubr.msk.f32.mxu0 %vm2771_vm0, %v2770_v10  ;;  %2406 = vmatprep.subr.mxu1 %v2770_v10  ;;  %v4239_v21 = vand.u32 4294901760, %v3339_v35 }
  0xbe   : > { %v4317_v25 = vsel %vm3349_vm10, 4294967295, %v4316_v25  ;;  %v414_v32 = vsel %vm3349_vm10, 1.0, %v2770_v10  ;;  %2407 = vmatpush3.msra.mxu1 %v2941_v38  ;;  %2319 = vmatprep.subr.mxu0 %v2770_v10  ;;  %v342_v44 = vpop.permute.xlu1 %341 }
  0xbf   : > { %4318 = vst [vmem:[#allocation13_spill] sm:$0xff] %v4317_v25  ;;  %v3365_v59 = vsub.f32 %v414_v32, %v414_v32  ;;  %2271 = vmatmul.mubr.msk.f32.gmra.mxu1 %vm3323_vm2, %v2772_v2  ;;  %v247_v39 = vpop.permute.xlu0 %246  ;;  %2320 = vmatpush3.msra.mxu0 %v2979_v54  ;;  %vm377_vm11 = vcmp.eq.s32.totalorder %v3139_v34, %v342_v44  ;;  %v587_v44 = vand.u32 4294901760, %v586_v19  ;;  %v4322_v19 = vmov 0 }
  0xc0   : > { %2176 = vmatmul.mubr.f32.gmra.mxu0 %v578_v52  ;;  %vm282_vm14 = vcmp.eq.s32.totalorder %v3139_v34, %v247_v39  ;;  %2273 = vmatprep.mubr.msk.f32.mxu1 %vm2771_vm0, %v2770_v10  ;;  %v595_v39 = vsub.f32 %v3339_v35, %v4239_v21 }
  0xc1   : > { %vm3375_vm1 = vmor %vm282_vm14, %vm377_vm11  ;;  %2178 = vmatprep.mubr.msk.f32.mxu0 %vm2771_vm0, %v2770_v10  ;;  %2408 = vmatprep.subr.mxu1 %v2770_v10  ;;  %v4244_v52 = vand.u32 4294901760, %v3365_v59 }
  0xc2   : > { %v4320_v20 = vsel %vm3375_vm1, 4294967295, %v4319_v20  ;;  %v415_v32 = vsel %vm3375_vm1, 1.0, %v2770_v10  ;;  %2409 = vmatpush3.msra.mxu1 %v2953_v43  ;;  %2321 = vmatprep.subr.mxu0 %v2770_v10  ;;  %v345_v33 = vpop.permute.xlu1 %344 }
  0xc3   : > { %4321 = vst [vmem:[#allocation14_spill] sm:$0xff] %v4320_v20  ;;  %v3391_v37 = vsub.f32 %v415_v32, %v415_v32  ;;  %2274 = vmatmul.mubr.msk.f32.gmra.mxu1 %vm3349_vm10, %v2772_v2  ;;  %v250_v50 = vpop.permute.xlu0 %249  ;;  %2322 = vmatpush3.msra.mxu0 %v2996_v62  ;;  %vm378_vm4 = vcmp.eq.s32.totalorder %v3139_v34, %v345_v33  ;;  %v596_v33 = vand.u32 4294901760, %v595_v39  ;;  %v4325_v39 = vmov 0 }
  0xc4   : > { %2179 = vmatmul.mubr.f32.gmra.mxu0 %v587_v44  ;;  %vm283_vm7 = vcmp.eq.s32.totalorder %v3139_v34, %v250_v50  ;;  %2276 = vmatprep.mubr.msk.f32.mxu1 %vm2771_vm0, %v2770_v10  ;;  %v604_v50 = vsub.f32 %v3365_v59, %v4244_v52 }
  0xc5   : > { %vm3401_vm11 = vmor %vm283_vm7, %vm378_vm4  ;;  %2181 = vmatprep.mubr.msk.f32.mxu0 %vm2771_vm0, %v2770_v10  ;;  %2410 = vmatprep.subr.mxu1 %v2770_v10  ;;  %v4251_v44 = vand.u32 4294901760, %v3391_v37 }
  0xc6   : > { %v4323_v19 = vsel %vm3401_vm11, 4294967295, %v4322_v19  ;;  %v416_v32 = vsel %vm3401_vm11, 1.0, %v2770_v10  ;;  %2411 = vmatpush3.msra.mxu1 %v2970_v51  ;;  %2323 = vmatprep.subr.mxu0 %v2770_v10  ;;  %v348_v25 = vpop.permute.xlu1 %347 }
  0xc7   : > { %4324 = vst [vmem:[#allocation15_spill] sm:$0xff] %v4323_v19  ;;  %v3417_v21 = vsub.f32 %v416_v32, %v416_v32  ;;  %2277 = vmatmul.mubr.msk.f32.gmra.mxu1 %vm3375_vm1, %v2772_v2  ;;  %v253_v23 = vpop.permute.xlu0 %252  ;;  %2324 = vmatpush3.msra.mxu0 %v3013_v9  ;;  %vm379_vm14 = vcmp.eq.s32.totalorder %v3139_v34, %v348_v25  ;;  %v605_v25 = vand.u32 4294901760, %v604_v50  ;;  %v4328_v50 = vmov 0 }
  0xc8   : > { %2182 = vmatmul.mubr.f32.gmra.mxu0 %v596_v33  ;;  %vm284_vm4 = vcmp.eq.s32.totalorder %v3139_v34, %v253_v23  ;;  %2279 = vmatprep.mubr.msk.f32.mxu1 %vm2771_vm0, %v2770_v10  ;;  %v613_v23 = vsub.f32 %v3391_v37, %v4251_v44 }
  0xc9   : > { %vm3427_vm7 = vmor %vm284_vm4, %vm379_vm14  ;;  %2184 = vmatprep.mubr.msk.f32.mxu0 %vm2771_vm0, %v2770_v10  ;;  %2412 = vmatprep.subr.mxu1 %v2770_v10  ;;  %v4258_v33 = vand.u32 4294901760, %v3417_v21 }
  0xca   : > { %v4326_v39 = vsel %vm3427_vm7, 4294967295, %v4325_v39  ;;  %v417_v32 = vsel %vm3427_vm7, 1.0, %v2770_v10  ;;  %2413 = vmatpush3.msra.mxu1 %v2990_v60  ;;  %2325 = vmatprep.subr.mxu0 %v2770_v10  ;;  %v351_v20 = vpop.permute.xlu1 %350 }
  0xcb   : > { %4327 = vst [vmem:[#allocation16_spill] sm:$0xff] %v4326_v39  ;;  %v3443_v52 = vsub.f32 %v417_v32, %v417_v32  ;;  %2280 = vmatmul.mubr.msk.f32.gmra.mxu1 %vm3401_vm11, %v2772_v2  ;;  %v256_v57 = vpop.permute.xlu0 %255  ;;  %2326 = vmatpush3.msra.mxu0 %v3028_v29  ;;  %vm380_vm14 = vcmp.eq.s32.totalorder %v3139_v34, %v351_v20  ;;  %v614_v20 = vand.u32 4294901760, %v613_v23  ;;  %v4331_v23 = vmov 0 }
  0xcc   : > { %2185 = vmatmul.mubr.f32.gmra.mxu0 %v605_v25  ;;  %vm285_vm4 = vcmp.eq.s32.totalorder %v3139_v34, %v256_v57  ;;  %2282 = vmatprep.mubr.msk.f32.mxu1 %vm2771_vm0, %v2770_v10  ;;  %v622_v57 = vsub.f32 %v3417_v21, %v4258_v33 }
  0xcd   : > { %vm3453_vm1 = vmor %vm285_vm4, %vm380_vm14  ;;  %2187 = vmatprep.mubr.msk.f32.mxu0 %vm2771_vm0, %v2770_v10  ;;  %2414 = vmatprep.subr.mxu1 %v2770_v10  ;;  %v4265_v25 = vand.u32 4294901760, %v3443_v52 }
  0xce   : > { %v4329_v50 = vsel %vm3453_vm1, 4294967295, %v4328_v50  ;;  %v418_v32 = vsel %vm3453_vm1, 1.0, %v2770_v10  ;;  %2415 = vmatpush3.msra.mxu1 %v3002_v1  ;;  %2327 = vmatprep.subr.mxu0 %v2770_v10  ;;  %v354_v19 = vpop.permute.xlu1 %353 }
  0xcf   : > { %4330 = vst [vmem:[#allocation17_spill] sm:$0xff] %v4329_v50  ;;  %v3469_v44 = vsub.f32 %v418_v32, %v418_v32  ;;  %2283 = vmatmul.mubr.msk.f32.gmra.mxu1 %vm3427_vm7, %v2772_v2  ;;  %v259_v61 = vpop.permute.xlu0 %258  ;;  %2328 = vmatpush3.msra.mxu0 %v3045_v41  ;;  %vm381_vm14 = vcmp.eq.s32.totalorder %v3139_v34, %v354_v19  ;;  %v623_v19 = vand.u32 4294901760, %v622_v57  ;;  %v4334_v57 = vmov 0 }
  0xd0   : > { %2188 = vmatmul.mubr.f32.gmra.mxu0 %v614_v20  ;;  %vm286_vm4 = vcmp.eq.s32.totalorder %v3139_v34, %v259_v61  ;;  %2285 = vmatprep.mubr.msk.f32.mxu1 %vm2771_vm0, %v2770_v10  ;;  %v631_v61 = vsub.f32 %v3443_v52, %v4265_v25 }
  0xd1   : > { %vm3479_vm11 = vmor %vm286_vm4, %vm381_vm14  ;;  %2190 = vmatprep.mubr.msk.f32.mxu0 %vm2771_vm0, %v2770_v10  ;;  %2416 = vmatprep.subr.mxu1 %v2770_v10  ;;  %v4272_v20 = vand.u32 4294901760, %v3469_v44 }
  0xd2   : > { %v4332_v23 = vsel %vm3479_vm11, 4294967295, %v4331_v23  ;;  %v419_v32 = vsel %vm3479_vm11, 1.0, %v2770_v10  ;;  %2417 = vmatpush3.msra.mxu1 %v3019_v24  ;;  %2329 = vmatprep.subr.mxu0 %v2770_v10  ;;  %v357_v39 = vpop.permute.xlu1 %356 }
  0xd3   : > { %4333 = vst [vmem:[#allocation18_spill] sm:$0xff] %v4332_v23  ;;  %v3495_v33 = vsub.f32 %v419_v32, %v419_v32  ;;  %2286 = vmatmul.mubr.msk.f32.gmra.mxu1 %vm3453_vm1, %v2772_v2  ;;  %v262_v3 = vpop.permute.xlu0 %261  ;;  %2418 = vmatprep.subr.mxu1 %v2770_v10  ;;  %vm382_vm14 = vcmp.eq.s32.totalorder %v3139_v34, %v357_v39  ;;  %v632_v39 = vand.u32 4294901760, %v631_v61 }
  0xd4   : > { %2191 = vmatmul.mubr.f32.gmra.mxu0 %v623_v19  ;;  %vm287_vm4 = vcmp.eq.s32.totalorder %v3139_v34, %v262_v3  ;;  %2288 = vmatprep.mubr.msk.f32.mxu1 %vm2771_vm0, %v2770_v10  ;;  %v640_v3 = vsub.f32 %v3469_v44, %v4272_v20 }
  0xd5   : > { %vm3505_vm7 = vmor %vm287_vm4, %vm382_vm14  ;;  %2193 = vmatprep.mubr.msk.f32.mxu0 %vm2771_vm0, %v2770_v10  ;;  %2330 = vmatpush3.msra.mxu0 %v3062_v55  ;;  %v4279_v19 = vand.u32 4294901760, %v3495_v33 }
  0xd6   : > { %v4335_v57 = vsel %vm3505_vm7, 4294967295, %v4334_v57  ;;  %v420_v32 = vsel %vm3505_vm7, 1.0, %v2770_v10  ;;  %2419 = vmatpush3.msra.mxu1 %v3039_v36  ;;  %2331 = vmatprep.subr.mxu0 %v2770_v10  ;;  %v360_v50 = vpop.permute.xlu1 %359 }
  0xd7   : > { %4336 = vst [vmem:[#allocation19_spill] sm:$0xff] %v4335_v57  ;;  %v3521_v25 = vsub.f32 %v420_v32, %v420_v32  ;;  %2289 = vmatmul.mubr.msk.f32.gmra.mxu1 %vm3479_vm11, %v2772_v2  ;;  %v265_v7 = vpop.permute.xlu0 %264  ;;  %2420 = vmatprep.subr.mxu1 %v2770_v10  ;;  %vm383_vm14 = vcmp.eq.s32.totalorder %v3139_v34, %v360_v50  ;;  %v641_v50 = vand.u32 4294901760, %v640_v3 }
  0xd8   : > { %2194 = vmatmul.mubr.f32.gmra.mxu0 %v632_v39  ;;  %vm288_vm4 = vcmp.eq.s32.totalorder %v3139_v34, %v265_v7  ;;  %2291 = vmatprep.mubr.msk.f32.mxu1 %vm2771_vm0, %v2770_v10  ;;  %v649_v7 = vsub.f32 %v3495_v33, %v4279_v19 }
  0xd9   : > { %vm3531_vm1 = vmor %vm288_vm4, %vm383_vm14  ;;  %2196 = vmatprep.mubr.msk.f32.mxu0 %vm2771_vm0, %v2770_v10  ;;  %2421 = vmatpush3.msra.mxu1 %v3051_v46  ;;  %v4286_v39 = vand.u32 4294901760, %v3521_v25 }
  0xda   : > { %v421_v32 = vsel %vm3531_vm1, 1.0, %v2770_v10  ;;  %2422 = vmatprep.subr.mxu1 %v2770_v10  ;;  %2332 = vmatpush3.msra.mxu0 %v3074_v63  ;;  %v363_v23 = vpop.permute.xlu1 %362 }
  0xdb   : > { %v3547_v20 = vsub.f32 %v421_v32, %v421_v32  ;;  %2292 = vmatmul.mubr.msk.f32.gmra.mxu1 %vm3505_vm7, %v2772_v2  ;;  %v268_v28 = vpop.permute.xlu0 %267  ;;  %2333 = vmatprep.subr.mxu0 %v2770_v10  ;;  %vm384_vm14 = vcmp.eq.s32.totalorder %v3139_v34, %v363_v23  ;;  %v650_v23 = vand.u32 4294901760, %v649_v7 }
  0xdc   : > { %2197 = vmatmul.mubr.f32.gmra.mxu0 %v641_v50  ;;  %vm289_vm4 = vcmp.eq.s32.totalorder %v3139_v34, %v268_v28  ;;  %2294 = vmatprep.mubr.msk.f32.mxu1 %vm2771_vm0, %v2770_v10  ;;  %v658_v28 = vsub.f32 %v3521_v25, %v4286_v39 }
  0xdd   : > { %vm3557_vm11 = vmor %vm289_vm4, %vm384_vm14  ;;  %2199 = vmatprep.mubr.msk.f32.mxu0 %vm2771_vm0, %v2770_v10  ;;  %2423 = vmatpush3.msra.mxu1 %v3068_v58  ;;  %v4287_v50 = vand.u32 4294901760, %v3547_v20 }
  0xde   : > { %v422_v32 = vsel %vm3557_vm11, 1.0, %v2770_v10  ;;  %2334 = vmatpush3.msra.mxu0 %v3087_v27  ;;  %2570 = vmatprep.subr.mxu1 %v2770_v10  ;;  %v366_v57 = vpop.permute.xlu1 %365  ;;  %v659_v39 = vand.u32 4294901760, %v658_v28 }
  0xdf   : > { %v3573_v19 = vsub.f32 %v422_v32, %v422_v32  ;;  %2295 = vmatmul.mubr.msk.f32.gmra.mxu1 %vm3531_vm1, %v2772_v2  ;;  %v271_v49 = vpop.permute.xlu0 %270  ;;  %2481 = vmatprep.subr.mxu0 %v2770_v10  ;;  %vm385_vm14 = vcmp.eq.s32.totalorder %v3139_v34, %v366_v57  ;;  %v667_v57 = vsub.f32 %v3547_v20, %v4287_v50 }
  0xe0   : > { %2200 = vmatmul.mubr.f32.gmra.mxu0 %v650_v23  ;;  %vm290_vm4 = vcmp.eq.s32.totalorder %v3139_v34, %v271_v49  ;;  %2297 = vmatprep.mubr.msk.f32.mxu1 %vm2771_vm0, %v2770_v10 }
  0xe1   : > { %vm3583_vm7 = vmor %vm290_vm4, %vm385_vm14  ;;  %2202 = vmatprep.mubr.msk.f32.mxu0 %vm2771_vm0, %v2770_v10  ;;  %v675_v34 = vand.u32 4294901760, %v3573_v19  ;;  %v668_v23 = vand.u32 4294901760, %v667_v57  ;;  %v4343_v57 = vand.u32 4294901760, %v3164_v18 }
  0xe2   : > { %v423_v32 = vsel %vm3583_vm7, 1.0, %v2770_v10 }
  0xe3   : > { %v3596_v49 = vsub.f32 %v423_v32, %v423_v32  ;;  %2298 = vmatmul.mubr.msk.f32.gmra.mxu1 %vm3557_vm11, %v2772_v2  ;;  %v676_v28 = vsub.f32 %v3573_v19, %v675_v34 }
  0xe4   : > { %2203 = vmatmul.mubr.f32.gmra.mxu0 %v659_v39  ;;  %2300 = vmatprep.mubr.msk.f32.mxu1 %vm2771_vm0, %v2770_v10 }
  0xe5   : > { %2205 = vmatprep.mubr.msk.f32.mxu0 %vm2771_vm0, %v2770_v10  ;;  %v684_v50 = vand.u32 4294901760, %v3596_v49  ;;  %v677_v39 = vand.u32 4294901760, %v676_v28  ;;  %v4344_v28 = vand.u32 4294901760, %v3156_v56 }
  0xe7   : > { %2301 = vmatmul.mubr.msk.f32.gmra.mxu1 %vm3583_vm7, %v2772_v2  ;;  %v685_v32 = vsub.f32 %v3596_v49, %v684_v50 }
  0xe8   : > { %2206 = vmatmul.mubr.f32.gmra.mxu0 %v668_v23  ;;  %2424 = vmatprep.mubr.msk.f32.mxu1 %vm2771_vm0, %v2770_v10 }
  0xe9   : > { %2208 = vmatprep.mubr.msk.f32.mxu0 %vm2771_vm0, %v2770_v10  ;;  %v686_v23 = vand.u32 4294901760, %v685_v32  ;;  %v4348_v32 = vand.u32 4294901760, %v2879_v14  ;;  %v4351_v14 = vand.u32 4294901760, %v2886_v16  ;;  %v4355_v16 = vand.u32 4294901760, %v2931_v31 }
  0xea   : > { %v4359_v31 = vand.u32 4294901760, %v2964_v48  ;;  %v4365_v48 = vand.u32 4294901760, %v3013_v9  ;;  %v4372_v9 = vand.u32 4294901760, %v3521_v25 }
  0xeb   : > { %2425 = vmatmul.mubr.f32.vlgmr.msra.gmra.mxu1 %v4343_v57 }
  0xec   : > { %2209 = vmatmul.mubr.f32.gmra.mxu0 %v677_v39  ;;  %2427 = vmatprep.mubr.msk.f32.mxu1 %vm2771_vm0, %v2770_v10  ;;  %v4345_v39 = vand.u32 4294901760, %v3182_v47 }
  0xed   : > { %2211 = vmatprep.mubr.msk.f32.mxu0 %vm2771_vm0, %v2770_v10  ;;  %2571 = vmatpush3.msra.mxu1 %v2854_v4  ;;  %v4346_v4 = vand.u32 4294901760, %v2876_v13  ;;  %v4349_v13 = vand.u32 4294901760, %v2882_v15  ;;  %v4352_v15 = vand.u32 4294901760, %v3261_v0 }
  0xee   : > { %2572 = vmatprep.subr.mxu1 %v2770_v10 }
  0xef   : > { %2428 = vmatmul.mubr.f32.gmra.mxu1 %v4344_v28 }
  0xf0   : > { %2212 = vmatmul.mubr.f32.gmra.mxu0 %v686_v23  ;;  %2430 = vmatprep.mubr.msk.f32.mxu1 %vm2771_vm0, %v2770_v10 }
  0xf1   : > { %2335 = vmatprep.mubr.msk.f32.mxu0 %vm2771_vm0, %v2770_v10  ;;  %2573 = vmatpush3.msra.mxu1 %v2856_v5  ;;  %v4347_v5 = vand.u32 4294901760, %v3209_v30 }
  0xf2   : > { %2574 = vmatprep.subr.mxu1 %v2770_v10 }
  0xf3   : > { %2431 = vmatmul.mubr.f32.gmra.mxu1 %v4345_v39  ;;  %v4393_v39 = vld [vmem:[#allocation18_spill] sm:$0xff] }
  0xf4   : > { %2336 = vmatmul.mubr.f32.vlgmr.msra.gmra.mxu0 %v3164_v18  ;;  %2433 = vmatprep.mubr.msk.f32.mxu1 %vm2771_vm0, %v2770_v10 }
  0xf5   : > { %2482 = vmatpush3.msra.mxu0 %v4346_v4  ;;  %2338 = vmatprep.mubr.msk.f32.mxu0 %vm2771_vm0, %v2770_v10 }
  0xf6   : > { %2483 = vmatprep.subr.mxu0 %v2770_v10  ;;  %2575 = vmatpush3.msra.mxu1 %v2858_v6  ;;  %v4350_v6 = vand.u32 4294901760, %v3235_v45 }
  0xf7   : > { %2434 = vmatmul.mubr.f32.gmra.mxu1 %v4347_v5  ;;  %2484 = vmatpush3.msra.mxu0 %v4348_v32 }
  0xf8   : > { %2339 = vmatmul.mubr.f32.gmra.mxu0 %v3156_v56  ;;  %2436 = vmatprep.mubr.msk.f32.mxu1 %vm2771_vm0, %v2770_v10  ;;  %v4353_v56 = vand.u32 4294901760, %v2899_v22  ;;  %v4357_v22 = vand.u32 4294901760, %v2947_v40  ;;  %v4361_v40 = vand.u32 4294901760, %v2979_v54  ;;  %v4367_v54 = vand.u32 4294901760, %v3028_v29 }
  0xf9   : > { %2341 = vmatprep.mubr.msk.f32.mxu0 %vm2771_vm0, %v2770_v10  ;;  %2485 = vmatprep.subr.mxu0 %v2770_v10  ;;  %v4374_v29 = vand.u32 4294901760, %v3547_v20 }
  0xfa   : > { %2486 = vmatpush3.msra.mxu0 %v4349_v13  ;;  %2576 = vmatprep.subr.mxu1 %v2770_v10 }
  0xfb   : > { %2437 = vmatmul.mubr.f32.gmra.mxu1 %v4350_v6  ;;  %2487 = vmatprep.subr.mxu0 %v2770_v10 }
  0xfc   : > { %2342 = vmatmul.mubr.f32.gmra.mxu0 %v3182_v47  ;;  %2439 = vmatprep.mubr.msk.f32.mxu1 %vm2771_vm0, %v2770_v10  ;;  %v4385_v47 = vld [vmem:[#allocation14_spill] sm:$0xff] }
  0xfd   : > { %2344 = vmatprep.mubr.msk.f32.mxu0 %vm2771_vm0, %v2770_v10  ;;  %2488 = vmatpush3.msra.mxu0 %v4351_v14  ;;  %v4395_v14 = vld [vmem:[#allocation19_spill] sm:$0xff] }
  0xfe   : > { %2577 = vmatpush3.msra.mxu1 %v2870_v11  ;;  %2489 = vmatprep.subr.mxu0 %v2770_v10  ;;  %v4354_v11 = vand.u32 4294901760, %v3287_v42 }
  0xff   : > { %2440 = vmatmul.mubr.f32.gmra.mxu1 %v4352_v15  ;;  %2490 = vmatpush3.msra.mxu0 %v4353_v56 }
 0x100   : > { %2345 = vmatmul.mubr.f32.gmra.mxu0 %v3209_v30  ;;  %2442 = vmatprep.mubr.msk.f32.mxu1 %vm2771_vm0, %v2770_v10 }
 0x101   : > { %2347 = vmatprep.mubr.msk.f32.mxu0 %vm2771_vm0, %v2770_v10  ;;  %2578 = vmatprep.subr.mxu1 %v2770_v10 }
 0x102   : > { %2579 = vmatpush3.msra.mxu1 %v2873_v12  ;;  %2491 = vmatprep.subr.mxu0 %v2770_v10  ;;  %v4356_v12 = vand.u32 4294901760, %v3313_v8 }
 0x103   : > { %2443 = vmatmul.mubr.f32.gmra.mxu1 %v4354_v11  ;;  %2492 = vmatpush3.msra.mxu0 %v4355_v16 }
 0x104   : > { %2348 = vmatmul.mubr.f32.gmra.mxu0 %v3235_v45  ;;  %2445 = vmatprep.mubr.msk.f32.mxu1 %vm2771_vm0, %v2770_v10 }
 0x105   : > { %2350 = vmatprep.mubr.msk.f32.mxu0 %vm2771_vm0, %v2770_v10  ;;  %2580 = vmatprep.subr.mxu1 %v2770_v10 }
 0x106   : > { %2581 = vmatpush3.msra.mxu1 %v2889_v17  ;;  %2493 = vmatprep.subr.mxu0 %v2770_v10  ;;  %v4358_v17 = vand.u32 4294901760, %v3339_v35 }
 0x107   : > { %2446 = vmatmul.mubr.f32.gmra.mxu1 %v4356_v12  ;;  %2494 = vmatpush3.msra.mxu0 %v4357_v22 }
 0x108   : > { %2351 = vmatmul.mubr.f32.gmra.mxu0 %v3261_v0  ;;  %2448 = vmatprep.mubr.msk.f32.mxu1 %vm2771_vm0, %v2770_v10  ;;  %v4370_v0 = vand.u32 4294901760, %v3495_v33 }
 0x109   : > { %2353 = vmatprep.mubr.msk.f32.mxu0 %vm2771_vm0, %v2770_v10  ;;  %2582 = vmatprep.subr.mxu1 %v2770_v10 }
 0x10a   : > { %2583 = vmatpush3.msra.mxu1 %v2920_v26  ;;  %2495 = vmatprep.subr.mxu0 %v2770_v10  ;;  %v4360_v26 = vand.u32 4294901760, %v3365_v59 }
 0x10b   : > { %2449 = vmatmul.mubr.f32.gmra.mxu1 %v4358_v17  ;;  %2496 = vmatpush3.msra.mxu0 %v4359_v31 }
 0x10c   : > { %2354 = vmatmul.mubr.f32.gmra.mxu0 %v3287_v42  ;;  %2451 = vmatprep.mubr.msk.f32.mxu1 %vm2771_vm0, %v2770_v10  ;;  %v4363_v42 = vand.u32 4294901760, %v2996_v62  ;;  %v4369_v62 = vand.u32 4294901760, %v3045_v41 }
 0x10d   : > { %2356 = vmatprep.mubr.msk.f32.mxu0 %vm2771_vm0, %v2770_v10  ;;  %2584 = vmatprep.subr.mxu1 %v2770_v10 }
 0x10e   : > { %2585 = vmatpush3.msra.mxu1 %v2941_v38  ;;  %2497 = vmatprep.subr.mxu0 %v2770_v10  ;;  %v4362_v38 = vand.u32 4294901760, %v3391_v37 }
 0x10f   : > { %2452 = vmatmul.mubr.f32.gmra.mxu1 %v4360_v26  ;;  %2498 = vmatpush3.msra.mxu0 %v4361_v40 }
 0x110   : > { %2357 = vmatmul.mubr.f32.gmra.mxu0 %v3313_v8  ;;  %2454 = vmatprep.mubr.msk.f32.mxu1 %vm2771_vm0, %v2770_v10 }
 0x111   : > { %2359 = vmatprep.mubr.msk.f32.mxu0 %vm2771_vm0, %v2770_v10  ;;  %2586 = vmatprep.subr.mxu1 %v2770_v10 }
 0x112   : > { %2587 = vmatpush3.msra.mxu1 %v2953_v43  ;;  %2499 = vmatprep.subr.mxu0 %v2770_v10  ;;  %v4364_v43 = vand.u32 4294901760, %v3417_v21 }
 0x113   : > { %2455 = vmatmul.mubr.f32.gmra.mxu1 %v4362_v38  ;;  %2500 = vmatpush3.msra.mxu0 %v4363_v42 }
 0x114   : > { %2360 = vmatmul.mubr.f32.gmra.mxu0 %v3339_v35  ;;  %2457 = vmatprep.mubr.msk.f32.mxu1 %vm2771_vm0, %v2770_v10 }
 0x115   : > { %2362 = vmatprep.mubr.msk.f32.mxu0 %vm2771_vm0, %v2770_v10  ;;  %2588 = vmatprep.subr.mxu1 %v2770_v10 }
 0x116   : > { %2589 = vmatpush3.msra.mxu1 %v2970_v51  ;;  %2501 = vmatprep.subr.mxu0 %v2770_v10  ;;  %v4366_v51 = vand.u32 4294901760, %v3443_v52 }
 0x117   : > { %2458 = vmatmul.mubr.f32.gmra.mxu1 %v4364_v43  ;;  %2502 = vmatpush3.msra.mxu0 %v4365_v48 }
 0x118   : > { %2363 = vmatmul.mubr.f32.gmra.mxu0 %v3365_v59  ;;  %2460 = vmatprep.mubr.msk.f32.mxu1 %vm2771_vm0, %v2770_v10  ;;  %v4387_v59 = vld [vmem:[#allocation15_spill] sm:$0xff] }
 0x119   : > { %2365 = vmatprep.mubr.msk.f32.mxu0 %vm2771_vm0, %v2770_v10  ;;  %2590 = vmatprep.subr.mxu1 %v2770_v10 }
 0x11a   : > { %2591 = vmatpush3.msra.mxu1 %v2990_v60  ;;  %2503 = vmatprep.subr.mxu0 %v2770_v10  ;;  %v4368_v60 = vand.u32 4294901760, %v3469_v44 }
 0x11b   : > { %2461 = vmatmul.mubr.f32.gmra.mxu1 %v4366_v51  ;;  %2504 = vmatpush3.msra.mxu0 %v4367_v54 }
 0x11c   : > { %2366 = vmatmul.mubr.f32.gmra.mxu0 %v3391_v37  ;;  %2463 = vmatprep.mubr.msk.f32.mxu1 %vm2771_vm0, %v2770_v10 }
 0x11d   : > { %2368 = vmatprep.mubr.msk.f32.mxu0 %vm2771_vm0, %v2770_v10  ;;  %2592 = vmatprep.subr.mxu1 %v2770_v10 }
 0x11e   : > { %2593 = vmatpush3.msra.mxu1 %v3002_v1  ;;  %2505 = vmatprep.subr.mxu0 %v2770_v10  ;;  %v4371_v1 = vand.u32 4294901760, %v3062_v55 }
 0x11f   : > { %2464 = vmatmul.mubr.f32.gmra.mxu1 %v4368_v60  ;;  %2506 = vmatpush3.msra.mxu0 %v4369_v62 }
 0x120   : > { %2369 = vmatmul.mubr.f32.gmra.mxu0 %v3417_v21  ;;  %2466 = vmatprep.mubr.msk.f32.mxu1 %vm2771_vm0, %v2770_v10 }
 0x121   : > { %2371 = vmatprep.mubr.msk.f32.mxu0 %vm2771_vm0, %v2770_v10  ;;  %2594 = vmatprep.subr.mxu1 %v2770_v10 }
 0x122   : > { %2595 = vmatpush3.msra.mxu1 %v3019_v24  ;;  %2507 = vmatprep.subr.mxu0 %v2770_v10  ;;  %v4373_v24 = vand.u32 4294901760, %v3074_v63 }
 0x123   : > { %2467 = vmatmul.mubr.f32.gmra.mxu1 %v4370_v0  ;;  %2596 = vmatprep.subr.mxu1 %v2770_v10 }
 0x124   : > { %2372 = vmatmul.mubr.f32.gmra.mxu0 %v3443_v52  ;;  %2469 = vmatprep.mubr.msk.f32.mxu1 %vm2771_vm0, %v2770_v10  ;;  %v4389_v52 = vld [vmem:[#allocation16_spill] sm:$0xff] }
 0x125   : > { %2374 = vmatprep.mubr.msk.f32.mxu0 %vm2771_vm0, %v2770_v10  ;;  %2508 = vmatpush3.msra.mxu0 %v4371_v1 }
 0x126   : > { %2597 = vmatpush3.msra.mxu1 %v3039_v36  ;;  %2509 = vmatprep.subr.mxu0 %v2770_v10  ;;  %v4375_v36 = vand.u32 4294901760, %v3087_v27 }
 0x127   : > { %2470 = vmatmul.mubr.f32.gmra.mxu1 %v4372_v9  ;;  %2598 = vmatprep.subr.mxu1 %v2770_v10 }
 0x128   : > { %2375 = vmatmul.mubr.f32.gmra.mxu0 %v3469_v44  ;;  %2472 = vmatprep.mubr.msk.f32.mxu1 %vm2771_vm0, %v2770_v10 }
 0x129   : > { %2377 = vmatprep.mubr.msk.f32.mxu0 %vm2771_vm0, %v2770_v10  ;;  %2599 = vmatpush3.msra.mxu1 %v3051_v46 }
 0x12a   : > { %2600 = vmatprep.subr.mxu1 %v2770_v10  ;;  %2510 = vmatpush3.msra.mxu0 %v4373_v24 }
 0x12b   : > { %2473 = vmatmul.mubr.f32.gmra.mxu1 %v4374_v29  ;;  %2511 = vmatprep.subr.mxu0 %v2770_v10 }
 0x12c   : > { %2378 = vmatmul.mubr.f32.gmra.mxu0 %v3495_v33  ;;  %2475 = vmatprep.mubr.msk.f32.mxu1 %vm2771_vm0, %v2770_v10 }
 0x12d   : > { %2380 = vmatprep.mubr.msk.f32.mxu0 %vm2771_vm0, %v2770_v10  ;;  %2601 = vmatpush3.msra.mxu1 %v3068_v58 }
 0x12e   : > { %2512 = vmatpush3.msra.mxu0 %v4375_v36 }
 0x12f   : > { %2476 = vmatmul.mubr.f32.gmra.mxu1 %v675_v34 }
 0x130   : > { %2381 = vmatmul.mubr.f32.gmra.mxu0 %v3521_v25  ;;  %2478 = vmatprep.mubr.msk.f32.mxu1 %vm2771_vm0, %v2770_v10 }
 0x131   : > { %2383 = vmatprep.mubr.msk.f32.mxu0 %vm2771_vm0, %v2770_v10 }
 0x133   : > { %2479 = vmatmul.mubr.f32.gmra.mxu1 %v684_v50  ;;  %v4391_v50 = vld [vmem:[#allocation17_spill] sm:$0xff] }
 0x134   : > { %2384 = vmatmul.mubr.f32.gmra.mxu0 %v3547_v20  ;;  %2602 = vmatprep.mubr.msk.f32.mxu1 %vm2771_vm0, %v2770_v10 }
 0x135   : > { %2386 = vmatprep.mubr.msk.f32.mxu0 %vm2771_vm0, %v2770_v10 }
 0x137   : > { %2603 = vmatmul.mubr.msk.f32.vlgmr.msra.gmra.mxu1 %vm3152_vm6, %v2772_v2 }
 0x138   : > { %2387 = vmatmul.mubr.f32.gmra.mxu0 %v3573_v19  ;;  %2605 = vmatprep.mubr.msk.f32.mxu1 %vm2771_vm0, %v2770_v10 }
 0x139   : > { %2389 = vmatprep.mubr.msk.f32.mxu0 %vm2771_vm0, %v2770_v10 }
 0x13b   : > { %2606 = vmatmul.mubr.msk.f32.gmra.mxu1 %vm3145_vm5, %v2772_v2 }
 0x13c   : > { %2390 = vmatmul.mubr.f32.gmra.mxu0 %v3596_v49  ;;  %2608 = vmatprep.mubr.msk.f32.mxu1 %vm2771_vm0, %v2770_v10 }
 0x13d   : > { %2513 = vmatprep.mubr.msk.f32.mxu0 %vm2771_vm0, %v2770_v10 }
 0x13f   : > { %2609 = vmatmul.mubr.msk.f32.gmra.mxu1 %vm3171_vm9, %v2772_v2 }
 0x140   : > { %2514 = vmatmul.mubr.msk.f32.vlgmr.msra.gmra.mxu0 %vm3152_vm6, %v2772_v2  ;;  %2611 = vmatprep.mubr.msk.f32.mxu1 %vm2771_vm0, %v2770_v10  ;;  %vm4388_vm6 = vnez %v4387_v59 }
 0x141   : > { %2516 = vmatprep.mubr.msk.f32.mxu0 %vm2771_vm0, %v2770_v10 }
 0x143   : > { %2612 = vmatmul.mubr.msk.f32.gmra.mxu1 %vm3196_vm12, %v2772_v2 }
 0x144   : > { %2517 = vmatmul.mubr.msk.f32.gmra.mxu0 %vm3145_vm5, %v2772_v2  ;;  %2614 = vmatprep.mubr.msk.f32.mxu1 %vm2771_vm0, %v2770_v10  ;;  %vm4386_vm5 = vnez %v4385_v47 }
 0x145   : > { %2519 = vmatprep.mubr.msk.f32.mxu0 %vm2771_vm0, %v2770_v10 }
 0x147   : > { %2615 = vmatmul.mubr.msk.f32.gmra.mxu1 %vm3220_vm15, %v2772_v2 }
 0x148   : > { %2520 = vmatmul.mubr.msk.f32.gmra.mxu0 %vm3171_vm9, %v2772_v2  ;;  %2617 = vmatprep.mubr.msk.f32.mxu1 %vm2771_vm0, %v2770_v10  ;;  %vm4390_vm9 = vnez %v4389_v52 }
 0x149   : > { %2522 = vmatprep.mubr.msk.f32.mxu0 %vm2771_vm0, %v2770_v10 }
 0x14b   : > { %2618 = vmatmul.mubr.msk.f32.gmra.mxu1 %vm3245_vm3, %v2772_v2 }
 0x14c   : > { %2523 = vmatmul.mubr.msk.f32.gmra.mxu0 %vm3196_vm12, %v2772_v2  ;;  %2620 = vmatprep.mubr.msk.f32.mxu1 %vm2771_vm0, %v2770_v10  ;;  %vm4392_vm12 = vnez %v4391_v50 }
 0x14d   : > { %2525 = vmatprep.mubr.msk.f32.mxu0 %vm2771_vm0, %v2770_v10 }
 0x14f   : > { %2621 = vmatmul.mubr.msk.f32.gmra.mxu1 %vm3271_vm8, %v2772_v2 }
 0x150   : > { %2526 = vmatmul.mubr.msk.f32.gmra.mxu0 %vm3220_vm15, %v2772_v2  ;;  %2623 = vmatprep.mubr.msk.f32.mxu1 %vm2771_vm0, %v2770_v10  ;;  %vm4394_vm15 = vnez %v4393_v39 }
 0x151   : > { %2528 = vmatprep.mubr.msk.f32.mxu0 %vm2771_vm0, %v2770_v10 }
 0x153   : > { %2624 = vmatmul.mubr.msk.f32.gmra.mxu1 %vm3297_vm13, %v2772_v2 }
 0x154   : > { %2529 = vmatmul.mubr.msk.f32.gmra.mxu0 %vm3245_vm3, %v2772_v2  ;;  %2626 = vmatprep.mubr.msk.f32.mxu1 %vm2771_vm0, %v2770_v10  ;;  %vm4396_vm3 = vnez %v4395_v14 }
 0x155   : > { %2531 = vmatprep.mubr.msk.f32.mxu0 %vm2771_vm0, %v2770_v10 }
 0x157   : > { %2627 = vmatmul.mubr.msk.f32.gmra.mxu1 %vm3323_vm2, %v2772_v2 }
 0x158   : > { %2532 = vmatmul.mubr.msk.f32.gmra.mxu0 %vm3271_vm8, %v2772_v2  ;;  %2629 = vmatprep.mubr.msk.f32.mxu1 %vm2771_vm0, %v2770_v10 }
 0x159   : > { %2534 = vmatprep.mubr.msk.f32.mxu0 %vm2771_vm0, %v2770_v10 }
 0x15b   : > { %2630 = vmatmul.mubr.msk.f32.gmra.mxu1 %vm3349_vm10, %v2772_v2 }
 0x15c   : > { %2535 = vmatmul.mubr.msk.f32.gmra.mxu0 %vm3297_vm13, %v2772_v2  ;;  %2632 = vmatprep.mubr.msk.f32.mxu1 %vm2771_vm0, %v2770_v10 }
 0x15d   : > { %2537 = vmatprep.mubr.msk.f32.mxu0 %vm2771_vm0, %v2770_v10 }
 0x15e   : > { %v838_v18 = vpop.f32.mrf.mxu1 }
 0x15f   : > { %2633 = vmatmul.mubr.msk.f32.gmra.mxu1 %vm4386_vm5, %v2772_v2 }
 0x160   : > { %2538 = vmatmul.mubr.msk.f32.gmra.mxu0 %vm3323_vm2, %v2772_v2  ;;  %2635 = vmatprep.mubr.msk.f32.mxu1 %vm2771_vm0, %v2770_v10  ;;  %v2248_v8 = vpop.f32.mrf.mxu1 }
 0x161   : > { %2540 = vmatprep.mubr.msk.f32.mxu0 %vm2771_vm0, %v2770_v10 }
 0x162   : > { %v843_v35 = vpop.f32.mrf.mxu1 }
 0x163   : > { %2636 = vmatmul.mubr.msk.f32.gmra.mxu1 %vm4388_vm6, %v2772_v2 }
 0x164   : > { %2541 = vmatmul.mubr.msk.f32.gmra.mxu0 %vm3349_vm10, %v2772_v2  ;;  %2638 = vmatprep.mubr.msk.f32.mxu1 %vm2771_vm0, %v2770_v10  ;;  %v2251_v37 = vpop.f32.mrf.mxu1 }
 0x165   : > { %2543 = vmatprep.mubr.msk.f32.mxu0 %vm2771_vm0, %v2770_v10 }
 0x167   : > { %v848_v21 = vpop.f32.mrf.mxu1  ;;  %2639 = vmatmul.mubr.msk.f32.gmra.mxu1 %vm4390_vm9, %v2772_v2 }
 0x168   : > { %v526_v44 = vpop.f32.mrf.mxu0  ;;  %2544 = vmatmul.mubr.msk.f32.gmra.mxu0 %vm4386_vm5, %v2772_v2  ;;  %2641 = vmatprep.mubr.msk.f32.mxu1 %vm2771_vm0, %v2770_v10 }
 0x169   : > { %v3952_v33 = vadd.f32 %v838_v18, %v526_v44  ;;  %v2254_v25 = vpop.f32.mrf.mxu1  ;;  %2546 = vmatprep.mubr.msk.f32.mxu0 %vm2771_vm0, %v2770_v10 }
 0x16a   : > { %v2159_v20 = vpop.f32.mrf.mxu0 }
 0x16b   : > { %v853_v19 = vpop.f32.mrf.mxu1  ;;  %2642 = vmatmul.mubr.msk.f32.gmra.mxu1 %vm4392_vm12, %v2772_v2 }
 0x16c   : > { %v535_v34 = vpop.f32.mrf.mxu0  ;;  %2547 = vmatmul.mubr.msk.f32.gmra.mxu0 %vm4388_vm6, %v2772_v2  ;;  %2644 = vmatprep.mubr.msk.f32.mxu1 %vm2771_vm0, %v2770_v10 }
 0x16d   : > { %v3964_v49 = vadd.f32 %v843_v35, %v535_v34  ;;  %v2257_v57 = vpop.f32.mrf.mxu1  ;;  %2549 = vmatprep.mubr.msk.f32.mxu0 %vm2771_vm0, %v2770_v10 }
 0x16e   : > { %v2162_v23 = vpop.f32.mrf.mxu0 }
 0x16f   : > { %v858_v28 = vpop.f32.mrf.mxu1  ;;  %2645 = vmatmul.mubr.msk.f32.gmra.mxu1 %vm4394_vm15, %v2772_v2 }
 0x170   : > { %v544_v4 = vpop.f32.mrf.mxu0  ;;  %2550 = vmatmul.mubr.msk.f32.gmra.mxu0 %vm4390_vm9, %v2772_v2  ;;  %2647 = vmatprep.mubr.msk.f32.mxu1 %vm2771_vm0, %v2770_v10 }
 0x171   : > { %v3976_v5 = vadd.f32 %v848_v21, %v544_v4  ;;  %v2260_v32 = vpop.f32.mrf.mxu1  ;;  %2552 = vmatprep.mubr.msk.f32.mxu0 %vm2771_vm0, %v2770_v10 }
 0x172   : > { %v2165_v13 = vpop.f32.mrf.mxu0 }
 0x173   : > { %v863_v6 = vpop.f32.mrf.mxu1  ;;  %2648 = vmatmul.mubr.msk.f32.gmra.mxu1 %vm4396_vm3, %v2772_v2 }
 0x174   : > { %v553_v15 = vpop.f32.mrf.mxu0  ;;  %2553 = vmatmul.mubr.msk.f32.gmra.mxu0 %vm4392_vm12, %v2772_v2  ;;  %2650 = vmatprep.mubr.msk.f32.mxu1 %vm2771_vm0, %v2770_v10 }
 0x175   : > { %v3988_v56 = vadd.f32 %v853_v19, %v553_v15  ;;  %v2263_v11 = vpop.f32.mrf.mxu1  ;;  %2555 = vmatprep.mubr.msk.f32.mxu0 %vm2771_vm0, %v2770_v10 }
 0x176   : > { %v2168_v16 = vpop.f32.mrf.mxu0 }
 0x177   : > { %v868_v12 = vpop.f32.mrf.mxu1  ;;  %2651 = vmatmul.mubr.msk.f32.gmra.mxu1 %vm3531_vm1, %v2772_v2 }
 0x178   : > { %v562_v22 = vpop.f32.mrf.mxu0  ;;  %2556 = vmatmul.mubr.msk.f32.gmra.mxu0 %vm4394_vm15, %v2772_v2  ;;  %2653 = vmatprep.mubr.msk.f32.mxu1 %vm2771_vm0, %v2770_v10 }
 0x179   : > { %v4000_v17 = vadd.f32 %v858_v28, %v562_v22  ;;  %v2266_v31 = vpop.f32.mrf.mxu1  ;;  %2558 = vmatprep.mubr.msk.f32.mxu0 %vm2771_vm0, %v2770_v10 }
 0x17a   : > { %v2171_v26 = vpop.f32.mrf.mxu0 }
 0x17b   : > { %v873_v40 = vpop.f32.mrf.mxu1  ;;  %2654 = vmatmul.mubr.msk.f32.gmra.mxu1 %vm3557_vm11, %v2772_v2 }
 0x17c   : > { %v571_v38 = vpop.f32.mrf.mxu0  ;;  %2559 = vmatmul.mubr.msk.f32.gmra.mxu0 %vm4396_vm3, %v2772_v2  ;;  %2656 = vmatprep.mubr.msk.f32.mxu1 %vm2771_vm0, %v2770_v10 }
 0x17d   : > { %v4012_v42 = vadd.f32 %v863_v6, %v571_v38  ;;  %v2269_v43 = vpop.f32.mrf.mxu1  ;;  %2561 = vmatprep.mubr.msk.f32.mxu0 %vm2771_vm0, %v2770_v10 }
 0x17e   : > { %v2174_v48 = vpop.f32.mrf.mxu0 }
 0x17f   : > { %v878_v51 = vpop.f32.mrf.mxu1  ;;  %2657 = vmatmul.mubr.msk.f32.gmra.mxu1 %vm3583_vm7, %v2772_v2 }
 0x180   : > { %v580_v54 = vpop.f32.mrf.mxu0  ;;  %2562 = vmatmul.mubr.msk.f32.gmra.mxu0 %vm3531_vm1, %v2772_v2 }
 0x181   : > { %v4022_v60 = vadd.f32 %v868_v12, %v580_v54  ;;  %v2272_v62 = vpop.f32.mrf.mxu1  ;;  %2564 = vmatprep.mubr.msk.f32.mxu0 %vm2771_vm0, %v2770_v10 }
 0x182   : > { %v2177_v0 = vpop.f32.mrf.mxu0 }
 0x183   : > { %v883_v1 = vpop.f32.mrf.mxu1 }
 0x184   : > { %v589_v9 = vpop.f32.mrf.mxu0  ;;  %2565 = vmatmul.mubr.msk.f32.gmra.mxu0 %vm3557_vm11, %v2772_v2 }
 0x185   : > { %v4029_v24 = vadd.f32 %v873_v40, %v589_v9  ;;  %v2275_v29 = vpop.f32.mrf.mxu1  ;;  %2567 = vmatprep.mubr.msk.f32.mxu0 %vm2771_vm0, %v2770_v10 }
 0x186   : > { %v2180_v61 = vpop.f32.mrf.mxu0 }
 0x187   : > { %v888_v36 = vpop.f32.mrf.mxu1 }
 0x188   : > { %v598_v41 = vpop.f32.mrf.mxu0  ;;  %2568 = vmatmul.mubr.msk.f32.gmra.mxu0 %vm3583_vm7, %v2772_v2 }
 0x189   : > { %v4036_v45 = vadd.f32 %v878_v51, %v598_v41  ;;  %v2278_v46 = vpop.f32.mrf.mxu1 }
 0x18a   : > { %v2183_v55 = vpop.f32.mrf.mxu0 }
 0x18b   : > { %v893_v58 = vpop.f32.mrf.mxu1 }
 0x18c   : > { %v607_v3 = vpop.f32.mrf.mxu0 }
 0x18d   : > { %v4038_v63 = vadd.f32 %v883_v1, %v607_v3  ;;  %v2281_v27 = vpop.f32.mrf.mxu1 }
 0x18e   : > { %v2186_v30 = vpop.f32.mrf.mxu0 }
 0x18f   : > { %v898_v53 = vpop.f32.mrf.mxu1 }
 0x190   : > { %v616_v18 = vpop.f32.mrf.mxu0 }
 0x191   : > { %v4040_v10 = vadd.f32 %v888_v36, %v616_v18  ;;  %v2284_v47 = vpop.f32.mrf.mxu1 }
 0x192   : > { %v2189_v8 = vpop.f32.mrf.mxu0 }
 0x193   : > { %v903_v35 = vpop.f32.mrf.mxu1 }
 0x194   : > { %v625_v59 = vpop.f32.mrf.mxu0 }
 0x195   : > { %v4042_v7 = vadd.f32 %v893_v58, %v625_v59  ;;  %v2287_v2 = vpop.f32.mrf.mxu1 }
 0x196   : > { %v2192_v37 = vpop.f32.mrf.mxu0 }
 0x197   : > { %v908_v21 = vpop.f32.mrf.mxu1 }
 0x198   : > { %v634_v52 = vpop.f32.mrf.mxu0 }
 0x199   : > { %v4044_v44 = vadd.f32 %v898_v53, %v634_v52  ;;  %v2290_v25 = vpop.f32.mrf.mxu1 }
 0x19a   : > { %v2195_v20 = vpop.f32.mrf.mxu0 }
 0x19b   : > { %v913_v19 = vpop.f32.mrf.mxu1 }
 0x19c   : > { %v643_v50 = vpop.f32.mrf.mxu0 }
 0x19d   : > { %v4046_v34 = vadd.f32 %v903_v35, %v643_v50  ;;  %v2293_v57 = vpop.f32.mrf.mxu1 }
 0x19e   : > { %v2198_v23 = vpop.f32.mrf.mxu0 }
 0x19f   : > { %v918_v28 = vpop.f32.mrf.mxu1 }
 0x1a0   : > { %v652_v39 = vpop.f32.mrf.mxu0 }
 0x1a1   : > { %v4048_v4 = vadd.f32 %v908_v21, %v652_v39  ;;  %v2296_v32 = vpop.f32.mrf.mxu1 }
 0x1a2   : > { %v2201_v13 = vpop.f32.mrf.mxu0 }
 0x1a3   : > { %v923_v6 = vpop.f32.mrf.mxu1 }
 0x1a4   : > { %v661_v14 = vpop.f32.mrf.mxu0 }
 0x1a5   : > { %v4050_v15 = vadd.f32 %v913_v19, %v661_v14  ;;  %v2299_v11 = vpop.f32.mrf.mxu1 }
 0x1a6   : > { %v2204_v16 = vpop.f32.mrf.mxu0 }
 0x1a7   : > { %v928_v12 = vpop.f32.mrf.mxu1 }
 0x1a8   : > { %v670_v22 = vpop.f32.mrf.mxu0 }
 0x1a9   : > { %v4052_v31 = vadd.f32 %v918_v28, %v670_v22  ;;  %v2302_v26 = vpop.f32.mrf.mxu1 }
 0x1aa   : > { %v2207_v40 = vpop.f32.mrf.mxu0 }
 0x1ab   : > { %v1227_v38 = vpop.f32.mrf.mxu1 }
 0x1ac   : > { %v679_v43 = vpop.f32.mrf.mxu0 }
 0x1ad   : > { %v4054_v48 = vadd.f32 %v923_v6, %v679_v43  ;;  %v2426_v51 = vpop.f32.mrf.mxu1 }
 0x1ae   : > { %v2210_v54 = vpop.f32.mrf.mxu0 }
 0x1af   : > { %v1234_v62 = vpop.f32.mrf.mxu1 }
 0x1b0   : > { %v688_v0 = vpop.f32.mrf.mxu0 }
 0x1b1   : > { %v4056_v1 = vadd.f32 %v928_v12, %v688_v0  ;;  %v2429_v9 = vpop.f32.mrf.mxu1 }
 0x1b2   : > { %v2213_v29 = vpop.f32.mrf.mxu0 }
 0x1b3   : > { %v1241_v61 = vpop.f32.mrf.mxu1 }
 0x1b4   : > { %v1031_v36 = vpop.f32.mrf.mxu0 }
 0x1b5   : > { %v1032_v41 = vadd.f32 %v1031_v36, %v3952_v33  ;;  %v2432_v46 = vpop.f32.mrf.mxu1 }
 0x1b6   : > { %v2337_v55 = vpop.f32.mrf.mxu0 }
 0x1b7   : > { %v1248_v58 = vpop.f32.mrf.mxu1  ;;  %v4059_v3 = vadd.f32 %v1227_v38, %v1032_v41 }
 0x1b8   : > { %v1037_v27 = vpop.f32.mrf.mxu0 }
 0x1b9   : > { %v1038_v30 = vadd.f32 %v1037_v27, %v3964_v49  ;;  %v2435_v53 = vpop.f32.mrf.mxu1 }
 0x1ba   : > { %v2340_v18 = vpop.f32.mrf.mxu0 }
 0x1bb   : > { %v1255_v47 = vpop.f32.mrf.mxu1  ;;  %v4062_v8 = vadd.f32 %v1234_v62, %v1038_v30 }
 0x1bc   : > { %v1043_v35 = vpop.f32.mrf.mxu0 }
 0x1bd   : > { %v1044_v59 = vadd.f32 %v1043_v35, %v3976_v5  ;;  %v2438_v2 = vpop.f32.mrf.mxu1 }
 0x1be   : > { %v2343_v37 = vpop.f32.mrf.mxu0 }
 0x1bf   : > { %v1262_v21 = vpop.f32.mrf.mxu1  ;;  %v4065_v33 = vadd.f32 %v1241_v61, %v1044_v59 }
 0x1c0   : > { %v1049_v52 = vpop.f32.mrf.mxu0 }
 0x1c1   : > { %v1050_v25 = vadd.f32 %v1049_v52, %v3988_v56  ;;  %v2441_v20 = vpop.f32.mrf.mxu1 }
 0x1c2   : > { %v2346_v19 = vpop.f32.mrf.mxu0 }
 0x1c3   : > { %v1269_v50 = vpop.f32.mrf.mxu1  ;;  %v4068_v49 = vadd.f32 %v1248_v58, %v1050_v25 }
 0x1c4   : > { %v1055_v57 = vpop.f32.mrf.mxu0 }
 0x1c5   : > { %v1056_v23 = vadd.f32 %v1055_v57, %v4000_v17  ;;  %v2444_v28 = vpop.f32.mrf.mxu1 }
 0x1c6   : > { %v2349_v39 = vpop.f32.mrf.mxu0 }
 0x1c7   : > { %v1276_v32 = vpop.f32.mrf.mxu1  ;;  %v4071_v5 = vadd.f32 %v1255_v47, %v1056_v23 }
 0x1c8   : > { %v1061_v13 = vpop.f32.mrf.mxu0 }
 0x1c9   : > { %v1062_v6 = vadd.f32 %v1061_v13, %v4012_v42  ;;  %v2447_v14 = vpop.f32.mrf.mxu1 }
 0x1ca   : > { %v2352_v11 = vpop.f32.mrf.mxu0 }
 0x1cb   : > { %v1283_v16 = vpop.f32.mrf.mxu1  ;;  %v4074_v56 = vadd.f32 %v1262_v21, %v1062_v6 }
 0x1cc   : > { %v1067_v12 = vpop.f32.mrf.mxu0 }
 0x1cd   : > { %v1068_v22 = vadd.f32 %v1067_v12, %v4022_v60  ;;  %v2450_v26 = vpop.f32.mrf.mxu1 }
 0x1ce   : > { %v2355_v40 = vpop.f32.mrf.mxu0 }
 0x1cf   : > { %v1290_v38 = vpop.f32.mrf.mxu1  ;;  %v4077_v17 = vadd.f32 %v1269_v50, %v1068_v22 }
 0x1d0   : > { %v1073_v43 = vpop.f32.mrf.mxu0 }
 0x1d1   : > { %v1074_v51 = vadd.f32 %v1073_v43, %v4029_v24  ;;  %v2453_v54 = vpop.f32.mrf.mxu1 }
 0x1d2   : > { %v2358_v62 = vpop.f32.mrf.mxu0 }
 0x1d3   : > { %v1297_v0 = vpop.f32.mrf.mxu1  ;;  %v4080_v42 = vadd.f32 %v1276_v32, %v1074_v51 }
 0x1d4   : > { %v1079_v9 = vpop.f32.mrf.mxu0 }
 0x1d5   : > { %v1080_v29 = vadd.f32 %v1079_v9, %v4036_v45  ;;  %v2456_v61 = vpop.f32.mrf.mxu1 }
 0x1d6   : > { %v2361_v36 = vpop.f32.mrf.mxu0 }
 0x1d7   : > { %v1304_v41 = vpop.f32.mrf.mxu1  ;;  %v4083_v60 = vadd.f32 %v1283_v16, %v1080_v29 }
 0x1d8   : > { %v1085_v46 = vpop.f32.mrf.mxu0 }
 0x1d9   : > { %v1086_v55 = vadd.f32 %v1085_v46, %v4038_v63  ;;  %v2459_v58 = vpop.f32.mrf.mxu1 }
 0x1da   : > { %v2364_v27 = vpop.f32.mrf.mxu0 }
 0x1db   : > { %v1311_v30 = vpop.f32.mrf.mxu1  ;;  %v4086_v24 = vadd.f32 %v1290_v38, %v1086_v55 }
 0x1dc   : > { %v1091_v53 = vpop.f32.mrf.mxu0 }
 0x1dd   : > { %v1092_v18 = vadd.f32 %v1091_v53, %v4040_v10  ;;  %v2462_v47 = vpop.f32.mrf.mxu1 }
 0x1de   : > { %v2367_v35 = vpop.f32.mrf.mxu0 }
 0x1df   : > { %v1318_v59 = vpop.f32.mrf.mxu1  ;;  %v4089_v45 = vadd.f32 %v1297_v0, %v1092_v18 }
 0x1e0   : > { %v1097_v2 = vpop.f32.mrf.mxu0 }
 0x1e1   : > { %v1098_v37 = vadd.f32 %v1097_v2, %v4042_v7  ;;  %v2465_v21 = vpop.f32.mrf.mxu1 }
 0x1e2   : > { %v2370_v52 = vpop.f32.mrf.mxu0 }
 0x1e3   : > { %v1325_v25 = vpop.f32.mrf.mxu1  ;;  %v4092_v63 = vadd.f32 %v1304_v41, %v1098_v37 }
 0x1e4   : > { %v1103_v20 = vpop.f32.mrf.mxu0 }
 0x1e5   : > { %v1104_v19 = vadd.f32 %v1103_v20, %v4044_v44  ;;  %v2468_v50 = vpop.f32.mrf.mxu1 }
 0x1e6   : > { %v2373_v57 = vpop.f32.mrf.mxu0 }
 0x1e7   : > { %v1332_v23 = vpop.f32.mrf.mxu1  ;;  %v4095_v10 = vadd.f32 %v1311_v30, %v1104_v19 }
 0x1e8   : > { %v1109_v28 = vpop.f32.mrf.mxu0 }
 0x1e9   : > { %v1110_v39 = vadd.f32 %v1109_v28, %v4046_v34  ;;  %v2471_v32 = vpop.f32.mrf.mxu1 }
 0x1ea   : > { %v2376_v13 = vpop.f32.mrf.mxu0 }
 0x1eb   : > { %v1339_v6 = vpop.f32.mrf.mxu1  ;;  %v4098_v7 = vadd.f32 %v1318_v59, %v1110_v39 }
 0x1ec   : > { %v1115_v14 = vpop.f32.mrf.mxu0 }
 0x1ed   : > { %v1116_v11 = vadd.f32 %v1115_v14, %v4048_v4  ;;  %v2474_v16 = vpop.f32.mrf.mxu1 }
 0x1ee   : > { %v2379_v12 = vpop.f32.mrf.mxu0 }
 0x1ef   : > { %v1346_v22 = vpop.f32.mrf.mxu1  ;;  %v4101_v44 = vadd.f32 %v1325_v25, %v1116_v11 }
 0x1f0   : > { %v1121_v26 = vpop.f32.mrf.mxu0 }
 0x1f1   : > { %v1122_v40 = vadd.f32 %v1121_v26, %v4050_v15  ;;  %v2477_v38 = vpop.f32.mrf.mxu1 }
 0x1f2   : > { %v2382_v43 = vpop.f32.mrf.mxu0 }
 0x1f3   : > { %v1353_v34 = vpop.f32.mrf.mxu1  ;;  %v4104_v51 = vadd.f32 %v1332_v23, %v1122_v40 }
 0x1f4   : > { %v1127_v54 = vpop.f32.mrf.mxu0 }
 0x1f5   : > { %v1128_v62 = vadd.f32 %v1127_v54, %v4052_v31  ;;  %v2480_v0 = vpop.f32.mrf.mxu1 }
 0x1f6   : > { %v2385_v4 = vpop.f32.mrf.mxu0 }
 0x1f7   : > { %v1647_v9 = vpop.f32.mrf.mxu1  ;;  %v4107_v29 = vadd.f32 %v1339_v6, %v1128_v62 }
 0x1f8   : > { %v1133_v61 = vpop.f32.mrf.mxu0 }
 0x1f9   : > { %v1134_v36 = vadd.f32 %v1133_v61, %v4054_v48  ;;  %v2604_v41 = vpop.f32.mrf.mxu1 }
 0x1fa   : > { %v2388_v15 = vpop.f32.mrf.mxu0 }
 0x1fb   : > { %v1652_v46 = vpop.f32.mrf.mxu1  ;;  %v4111_v55 = vadd.f32 %v1346_v22, %v1134_v36 }
 0x1fc   : > { %v1139_v58 = vpop.f32.mrf.mxu0 }
 0x1fd   : > { %v1140_v27 = vadd.f32 %v1139_v58, %v4056_v1  ;;  %v2607_v30 = vpop.f32.mrf.mxu1 }
 0x1fe   : > { %v2391_v31 = vpop.f32.mrf.mxu0 }
 0x1ff   : > { %v1657_v53 = vpop.f32.mrf.mxu1  ;;  %v4116_v18 = vadd.f32 %v1353_v34, %v1140_v27 }
 0x200   : > { %v1471_v47 = vpop.f32.mrf.mxu0 }
 0x201   : > { %v1472_v35 = vadd.f32 %v1471_v47, %v4059_v3  ;;  %v2610_v48 = vpop.f32.mrf.mxu1 }
 0x202   : > { %v2515_v59 = vpop.f32.mrf.mxu0 }
 0x203   : > { %v1648_v2 = vadd.f32 %v1647_v9, %v1472_v35  ;;  %v1662_v37 = vpop.f32.mrf.mxu1 }
 0x204   : > { %v1476_v21 = vpop.f32.mrf.mxu0 }
 0x205   : > { %1741 = vst [vmem:[%s4119_s30] sm:$0xff] %v1648_v2  ;;  %v1477_v1 = vadd.f32 %v1476_v21, %v4062_v8  ;;  %v2613_v52 = vpop.f32.mrf.mxu1 }
 0x206   : > { %v2518_v25 = vpop.f32.mrf.mxu0 }
 0x207   : > { %v1653_v20 = vadd.f32 %v1652_v46, %v1477_v1  ;;  %v1667_v19 = vpop.f32.mrf.mxu1 }
 0x208   : > { %v1481_v50 = vpop.f32.mrf.mxu0 }
 0x209   : > { %1742 = vst [vmem:[%s4119_s30 + $0x8] sm:$0xff] %v1653_v20  ;;  %v1482_v3 = vadd.f32 %v1481_v50, %v4065_v33  ;;  %v2616_v57 = vpop.f32.mrf.mxu1 }
 0x20a   : > { %v2521_v23 = vpop.f32.mrf.mxu0 }
 0x20b   : > { %v1658_v28 = vadd.f32 %v1657_v53, %v1482_v3  ;;  %v1672_v39 = vpop.f32.mrf.mxu1 }
 0x20c   : > { %v1486_v32 = vpop.f32.mrf.mxu0 }
 0x20d   : > { %1743 = vst [vmem:[%s4119_s30 + $0x10] sm:$0xff] %v1658_v28  ;;  %v1487_v13 = vadd.f32 %v1486_v32, %v4068_v49  ;;  %v2619_v6 = vpop.f32.mrf.mxu1 }
 0x20e   : > { %v2524_v8 = vpop.f32.mrf.mxu0 }
 0x20f   : > { %v1663_v14 = vadd.f32 %v1662_v37, %v1487_v13  ;;  %v1677_v11 = vpop.f32.mrf.mxu1 }
 0x210   : > { %v1491_v16 = vpop.f32.mrf.mxu0 }
 0x211   : > { %1744 = vst [vmem:[%s4119_s30 + $0x18] sm:$0xff] %v1663_v14  ;;  %v1492_v12 = vadd.f32 %v1491_v16, %v4071_v5  ;;  %v2622_v22 = vpop.f32.mrf.mxu1 }
 0x212   : > { %v2527_v33 = vpop.f32.mrf.mxu0 }
 0x213   : > { %v1668_v26 = vadd.f32 %v1667_v19, %v1492_v12  ;;  %v1682_v40 = vpop.f32.mrf.mxu1 }
 0x214   : > { %v1496_v38 = vpop.f32.mrf.mxu0 }
 0x215   : > { %1745 = vst [vmem:[%s4119_s30 + $0x20] sm:$0xff] %v1668_v26  ;;  %v1497_v43 = vadd.f32 %v1496_v38, %v4074_v56  ;;  %v2625_v34 = vpop.f32.mrf.mxu1 }
 0x216   : > { %v2530_v49 = vpop.f32.mrf.mxu0 }
 0x217   : > { %v1673_v54 = vadd.f32 %v1672_v39, %v1497_v43  ;;  %v1687_v62 = vpop.f32.mrf.mxu1 }
 0x218   : > { %v1501_v0 = vpop.f32.mrf.mxu0 }
 0x219   : > { %1746 = vst [vmem:[%s4119_s30 + $0x28] sm:$0xff] %v1673_v54  ;;  %v1502_v4 = vadd.f32 %v1501_v0, %v4077_v17  ;;  %v2628_v9 = vpop.f32.mrf.mxu1 }
 0x21a   : > { %v2533_v5 = vpop.f32.mrf.mxu0 }
 0x21b   : > { %v1678_v61 = vadd.f32 %v1677_v11, %v1502_v4  ;;  %v1692_v36 = vpop.f32.mrf.mxu1 }
 0x21c   : > { %v1506_v41 = vpop.f32.mrf.mxu0 }
 0x21d   : > { %1747 = vst [vmem:[%s4119_s30 + $0x30] sm:$0xff] %v1678_v61  ;;  %v1507_v15 = vadd.f32 %v1506_v41, %v4080_v42  ;;  %v2631_v46 = vpop.f32.mrf.mxu1 }
 0x21e   : > { %v2536_v56 = vpop.f32.mrf.mxu0 }
 0x21f   : > { %v1683_v58 = vadd.f32 %v1682_v40, %v1507_v15  ;;  %v1697_v27 = vpop.f32.mrf.mxu1 }
 0x220   : > { %v1511_v30 = vpop.f32.mrf.mxu0 }
 0x221   : > { %1748 = vst [vmem:[%s4119_s30 + $0x38] sm:$0xff] %v1683_v58  ;;  %v1512_v31 = vadd.f32 %v1511_v30, %v4083_v60  ;;  %v2634_v53 = vpop.f32.mrf.mxu1 }
 0x222   : > { %v2539_v17 = vpop.f32.mrf.mxu0 }
 0x223   : > { %v1688_v47 = vadd.f32 %v1687_v62, %v1512_v31  ;;  %v1702_v35 = vpop.f32.mrf.mxu1 }
 0x224   : > { %v1516_v48 = vpop.f32.mrf.mxu0 }
 0x225   : > { %1749 = vst [vmem:[%s4119_s30 + $0x40] sm:$0xff] %v1688_v47  ;;  %v1517_v59 = vadd.f32 %v1516_v48, %v4086_v24  ;;  %v2637_v2 = vpop.f32.mrf.mxu1 }
 0x226   : > { %v2542_v42 = vpop.f32.mrf.mxu0 }
 0x227   : > { %v1693_v37 = vadd.f32 %v1692_v36, %v1517_v59  ;;  %v1707_v21 = vpop.f32.mrf.mxu1 }
 0x228   : > { %v1521_v1 = vpop.f32.mrf.mxu0 }
 0x229   : > { %1750 = vst [vmem:[%s4119_s30 + $0x48] sm:$0xff] %v1693_v37  ;;  %v1522_v52 = vadd.f32 %v1521_v1, %v4089_v45  ;;  %v2640_v25 = vpop.f32.mrf.mxu1 }
 0x22a   : > { %v2545_v60 = vpop.f32.mrf.mxu0 }
 0x22b   : > { %v1698_v20 = vadd.f32 %v1697_v27, %v1522_v52  ;;  %v1712_v19 = vpop.f32.mrf.mxu1 }
 0x22c   : > { %v1526_v50 = vpop.f32.mrf.mxu0 }
 0x22d   : > { %1751 = vst [vmem:[%s4119_s30 + $0x50] sm:$0xff] %v1698_v20  ;;  %v1527_v3 = vadd.f32 %v1526_v50, %v4092_v63  ;;  %v2643_v57 = vpop.f32.mrf.mxu1 }
 0x22e   : > { %v2548_v24 = vpop.f32.mrf.mxu0 }
 0x22f   : > { %v1703_v23 = vadd.f32 %v1702_v35, %v1527_v3  ;;  %v1717_v28 = vpop.f32.mrf.mxu1 }
 0x230   : > { %v1531_v39 = vpop.f32.mrf.mxu0 }
 0x231   : > { %1752 = vst [vmem:[%s4119_s30 + $0x58] sm:$0xff] %v1703_v23  ;;  %v1532_v32 = vadd.f32 %v1531_v39, %v4095_v10  ;;  %v2646_v13 = vpop.f32.mrf.mxu1 }
 0x232   : > { %v2551_v45 = vpop.f32.mrf.mxu0 }
 0x233   : > { %v1708_v6 = vadd.f32 %v1707_v21, %v1532_v32  ;;  %v1722_v8 = vpop.f32.mrf.mxu1 }
 0x234   : > { %v1536_v14 = vpop.f32.mrf.mxu0 }
 0x235   : > { %1753 = vst [vmem:[%s4119_s30 + $0x60] sm:$0xff] %v1708_v6  ;;  %v1537_v11 = vadd.f32 %v1536_v14, %v4098_v7  ;;  %v2649_v16 = vpop.f32.mrf.mxu1 }
 0x236   : > { %v2554_v63 = vpop.f32.mrf.mxu0 }
 0x237   : > { %v1713_v12 = vadd.f32 %v1712_v19, %v1537_v11  ;;  %v1727_v22 = vpop.f32.mrf.mxu1 }
 0x238   : > { %v1541_v33 = vpop.f32.mrf.mxu0 }
 0x239   : > { %1754 = vst [vmem:[%s4119_s30 + $0x68] sm:$0xff] %v1713_v12  ;;  %v1542_v26 = vadd.f32 %v1541_v33, %v4101_v44  ;;  %v2652_v40 = vpop.f32.mrf.mxu1 }
 0x23a   : > { %v2557_v10 = vpop.f32.mrf.mxu0 }
 0x23b   : > { %v1718_v38 = vadd.f32 %v1717_v28, %v1542_v26  ;;  %v1732_v43 = vpop.f32.mrf.mxu1 }
 0x23c   : > { %v1546_v34 = vpop.f32.mrf.mxu0 }
 0x23d   : > { %1755 = vst [vmem:[%s4119_s30 + $0x70] sm:$0xff] %v1718_v38  ;;  %v1547_v49 = vadd.f32 %v1546_v34, %v4104_v51  ;;  %v2655_v7 = vpop.f32.mrf.mxu1 }
 0x23e   : > { %v2560_v54 = vpop.f32.mrf.mxu0 }
 0x23f   : > { %v1723_v62 = vadd.f32 %v1722_v8, %v1547_v49  ;;  %v1737_v0 = vpop.f32.mrf.mxu1 }
 0x240   : > { %v1551_v4 = vpop.f32.mrf.mxu0 }
 0x241   : > { %1756 = vst [vmem:[%s4119_s30 + $0x78] sm:$0xff] %v1723_v62  ;;  %v1552_v44 = vadd.f32 %v1551_v4, %v4107_v29  ;;  %v2658_v9 = vpop.f32.mrf.mxu1 }
 0x242   : > { %v2563_v5 = vpop.f32.mrf.mxu0 }
 0x243   : > { %v1728_v61 = vadd.f32 %v1727_v22, %v1552_v44 }
 0x244   : > { %v1556_v36 = vpop.f32.mrf.mxu0 }
 0x245   : > { %1757 = vst [vmem:[%s4119_s30 + $0x80] sm:$0xff] %v1728_v61  ;;  %v1557_v41 = vadd.f32 %v1556_v36, %v4111_v55 }
 0x246   : > { %v2566_v51 = vpop.f32.mrf.mxu0 }
 0x247   : > { %v1733_v15 = vadd.f32 %v1732_v43, %v1557_v41 }
 0x248   : > { %v1561_v46 = vpop.f32.mrf.mxu0 }
 0x249   : > { %1758 = vst [vmem:[%s4119_s30 + $0x88] sm:$0xff] %v1733_v15  ;;  %v1562_v56 = vadd.f32 %v1561_v46, %v4116_v18 }
 0x24a   : > { %v2569_v58 = vpop.f32.mrf.mxu0 }
 0x24b   : > { %v1738_v29 = vadd.f32 %v1737_v0, %v1562_v56 }
 0x24d   : > { %1759 = vst [vmem:[%s4119_s30 + $0x90] sm:$0xff] %v1738_v29 }
 0x24e   : > { %2720 = shalt.err (!%p2717_p3)
}
 0x24f   : > { %s2721_s19 = scalar_lea.hbm %s4162_s8, 2432  ;;  %s2725_s27 = scalar_lea.hbm %s4212_s3, 4864 }
 0x250   : > { %p2722_p4 = scmp.ne.s32.totalorder %s4162_s8, %s2721_s19  ;;  %p2726_p9 = scmp.lt.s32.totalorder %s4162_s8, %s4212_s3 }
 0x251   : > { %p2727_p10 = scmp.lt.s32.totalorder %s2725_s27, %s2721_s19 }
 0x252   : > { %p2723_p7 = pnand %p2722_p4, %p2834_p5 }
 0x253   : > { %p2728_p11 = por %p2727_p10, %p2726_p9 }
 0x254   : > { %p2724_p8 = pneg %p2723_p7 }
 0x256   : > { %p2729_p12 = pnand %p2728_p11, %p2724_p8 }
 0x258   : > { %2732 = shalt.err (!%p2729_p12)
}
 0x259   : > { %s2774_s25 = smov 128   ;;  %s2775_s28 = smov 8  }
 0x25a   : > { %2660 = dma.vmem_to_hbm [thread:$0]  (%p2834_p5), %s4164_s5, 2432, %s4162_s8, %s4169_s16, %s2774_s25, %s2774_s25, %s2775_s28  }
 0x25b PF: > { %p2666_p13 = scmp.ge.s32.totalorder %s2767_s15, 2  ;;  %s1789_s30 = sand.u32 1, %s2755_s12  }
 0x25c   : > { %s1790_s4 = scalar_lea.sflag [#allocation3], %s1789_s30 }
 0x25d   : > { %p2663_p0 = pnand %p2666_p13, %p2838_p6 }
 0x25f   : > { %p2664_p1 = pneg %p2663_p0 }
 0x261   : > { %2750 = dma.done.wait (%p2664_p1), %s1790_s4, 2432  }
 0x262   : > { %2752 = vsyncadd (%p2664_p1), %s1790_s4, 4294964864  ;;  %p13_p2 = scmp.ge.s32.totalorder %s2821_s18, 4   ;;  %s4397_s12 = smov %s2759_s13 }
 0x263   : > { %s4398_s13 = smov %s2763_s14  ;;  %s4399_s14 = smov %s2832_s21 }
 0x264   : > { %s4400_s15 = smov %s2821_s18  ;;  %15 = sbr.rel (!%p13_p2) target bundleno = 3 (0x3), region = 70 }
 0x269   :  { %1795 = vsyncpa [#allocation3], 1 }
 0x26a   :  { %1797 = vsyncpa [#allocation3 + $0x1], 1 }

</bundles_post_ra>
